<compile_context>
chip_gen: v6e
topology: v6e:2x2x1
jax: 0.10.0
libtpu: 0.0.40
codegen_flags: <defaults>
</compile_context>

<pallas_src>
import numpy as np
import jax
import jax.numpy as jnp
from jax import lax
from jax.experimental import pallas as pl
from jax.experimental.pallas import tpu as pltpu


def _round_up(x, m):
    return (x + m - 1) // m * m


def _clamp_vmem(nbytes):
    # Generous headroom for compiler-internal scratch; keep under v7x's
    # 64 MiB physical VMEM, but never below the v6e/v7x default scoped limit.
    return int(min(max(2 * nbytes + (2 << 20), 32 << 20), 64 << 20))


def _default_tile_rows():
    # v5-class MXUs are 128x128; v6e/v7x are 256-wide -> bigger row tiles.
    try:
        kind = jax.devices()[0].device_kind.lower()
    except Exception:  # pragma: no cover - defensive
        kind = ""
    if any(v in kind for v in ("v2", "v3", "v4", "v5")):
        return 128
    return 256


# ----------------------------------------------------------------------------
# Pallas kernels
# ----------------------------------------------------------------------------
def _lstm_kernel(x_ref, w_ih_ref, w_hh_ref, b_ref, out_ref,
                 preact_ref, h_ref, c_ref):
    """One time-chunk of the LSTM recurrence.

    x_ref    : (Tc, Bp, Ep)  bf16  time-major input chunk (padded)
    w_ih_ref : (Ep, 4*Hp)    bf16
    w_hh_ref : (Hp, 4*Hp)    bf16
    b_ref    : (1, 4*Hp)     f32   (b_ih + b_hh, per-gate padded)
    out_ref  : (Tc, Bp, Hp)  bf16  hidden states for this chunk
    preact_ref : (Tc, Bp, 4*Hp) f32 scratch (hoisted input projection)
    h_ref, c_ref : (Bp, Hp) f32 scratch (recurrent state, persists over grid)
    """
    Tc, Bp, Ep = x_ref.shape
    Hp = h_ref.shape[-1]
    H4 = w_hh_ref.shape[-1]

    @pl.when(pl.program_id(0) == 0)
    def _():
        h_ref[...] = jnp.zeros_like(h_ref)
        c_ref[...] = jnp.zeros_like(c_ref)

    # Hoisted input projection for this chunk: one MXU matmul over Tc*Bp rows.
    # (On v7x this projection could be split into its own row-parallel
    # pallas_call so both TensorCores participate; kept fused here.)
    x_all = x_ref[...].reshape(Tc * Bp, Ep)                       # bf16
    preact = jnp.dot(x_all, w_ih_ref[...],
                     preferred_element_type=jnp.float32)          # (Tc*Bp, 4Hp)
    preact_ref[...] = preact.reshape(Tc, Bp, H4) + b_ref[...]

    def step(t, carry):
        # Only the recurrent matmul remains in the serial loop.
        gates = preact_ref[t] + jnp.dot(
            h_ref[...].astype(jnp.bfloat16), w_hh_ref[...],
            preferred_element_type=jnp.float32)                   # (Bp, 4Hp)
        # Hp is a multiple of 128 -> lane-aligned vreg slices.
        i_g = jax.nn.sigmoid(gates[:, 0 * Hp:1 * Hp])
        f_g = jax.nn.sigmoid(gates[:, 1 * Hp:2 * Hp])
        g_g = jnp.tanh(gates[:, 2 * Hp:3 * Hp])
        o_g = jax.nn.sigmoid(gates[:, 3 * Hp:4 * Hp])

        c_new = f_g * c_ref[...] + i_g * g_g
        h_new = o_g * jnp.tanh(c_new)

        c_ref[...] = c_new
        h_ref[...] = h_new
        out_ref[t] = h_new.astype(out_ref.dtype)
        return carry

    # Capped unroll: the time-chunk grid is the outer loop; a small unroll
    # only needs to overlap the gate tail of step t with the matmul of t+1.
    lax.fori_loop(0, Tc, step, 0, unroll=min(Tc, 4))


def _linear_softmax_kernel(h_ref, w_ref, b_ref, out_ref):
    """Linear projection to vocab logits + exact softmax over the vocab axis.

    h_ref: (TN, Hp) bf16, w_ref: (Hp, Vp) bf16, b_ref: (1, Vp) f32,
    out_ref: (TN, Vp) f32.  Padded vocab columns carry a -1e30 bias so they
    contribute exp(...) == 0 to the normalization.
    """
    logits = jnp.dot(h_ref[...], w_ref[...],
                     preferred_element_type=jnp.float32) + b_ref[...]
    m = jnp.max(logits, axis=-1, keepdims=True)
    e = jnp.exp(logits - m)
    denom = jnp.sum(e, axis=-1, keepdims=True)
    out_ref[...] = e / denom


# ----------------------------------------------------------------------------
# pallas_call wrappers
# ----------------------------------------------------------------------------
def lstm_pallas(x_tm, w_ih, w_hh, b, time_chunk):
    """x_tm: (Sp, Bp, Ep) bf16 time-major (Sp % time_chunk == 0).
    Returns (Sp, Bp, Hp) bf16 hidden states."""
    Sp, Bp, Ep = x_tm.shape
    Hp, H4 = w_hh.shape
    Tc = time_chunk
    assert Sp % Tc == 0

    vmem_bytes = (2 * (Tc * Bp * Ep * 2)        # x chunks (double-buffered)
                  + 2 * (Tc * Bp * Hp * 2)      # out chunks (double-buffered)
                  + 2 * (Ep * H4 * 2)           # w_ih
                  + 2 * (Hp * H4 * 2)           # w_hh
                  + 2 * (H4 * 4)                # bias
                  + Tc * Bp * H4 * 4            # preact scratch
                  + 2 * Bp * Hp * 4)            # h, c scratch

    return pl.pallas_call(
        _lstm_kernel,
        out_shape=jax.ShapeDtypeStruct((Sp, Bp, Hp), jnp.bfloat16),
        grid=(Sp // Tc,),
        in_specs=[
            pl.BlockSpec((Tc, Bp, Ep), lambda i: (i, 0, 0)),
            pl.BlockSpec((Ep, H4), lambda i: (0, 0)),
            pl.BlockSpec((Hp, H4), lambda i: (0, 0)),
            pl.BlockSpec((1, H4), lambda i: (0, 0)),
        ],
        out_specs=pl.BlockSpec((Tc, Bp, Hp), lambda i: (i, 0, 0)),
        scratch_shapes=[
            pltpu.VMEM((Tc, Bp, H4), jnp.float32),   # per-chunk preactivations
            pltpu.VMEM((Bp, Hp), jnp.float32),       # h state
            pltpu.VMEM((Bp, Hp), jnp.float32),       # c state
        ],
        compiler_params=pltpu.CompilerParams(
            dimension_semantics=("arbitrary",),       # serial recurrence
            vmem_limit_bytes=_clamp_vmem(vmem_bytes)),
    )(x_tm, w_ih, w_hh, b)


def linear_softmax_pallas(h_packed, w, b, tile_rows):
    """h_packed: (Np, Hp) bf16. Returns softmax(h @ w + b) of shape (Np, Vp)."""
    Np, Hp = h_packed.shape
    Vp = w.shape[1]
    # TODO(synk): for very large vocabularies tile Vp with an online (two-pass)
    # softmax; here Hp*Vp + tile_rows*Vp fits comfortably in VMEM.
    # The weight/bias blocks are invariant across grid steps; single-buffering
    # them (pipeline_mode=pl.Buffered(1)) would save another Hp*Vp*2 bytes of
    # VMEM for huge vocabularies.
    vmem_bytes = (2 * (tile_rows * Hp * 2)
                  + 2 * (Hp * Vp * 2 + Vp * 4)
                  + 2 * (tile_rows * Vp * 4))
    return pl.pallas_call(
        _linear_softmax_kernel,
        out_shape=jax.ShapeDtypeStruct((Np, Vp), jnp.float32),
        grid=(Np // tile_rows,),
        in_specs=[
            pl.BlockSpec((tile_rows, Hp), lambda i: (i, 0)),
            pl.BlockSpec((Hp, Vp), lambda i: (0, 0)),
            pl.BlockSpec((1, Vp), lambda i: (0, 0)),
        ],
        out_specs=pl.BlockSpec((tile_rows, Vp), lambda i: (i, 0)),
        compiler_params=pltpu.CompilerParams(
            dimension_semantics=("parallel",),        # megacore on v7x
            vmem_limit_bytes=_clamp_vmem(vmem_bytes)),
    )(h_packed, w, b)


# ----------------------------------------------------------------------------
# DecoderRNN forward (glue in plain JAX, hot paths in Pallas)
# ----------------------------------------------------------------------------
def decoder_rnn_forward(params, features, captions, lengths, *, time_chunk=4):
    """Mirrors DecoderRNN.forward.

    features: (B, E) float32
    captions: (B, T) int32
    lengths : host list/np array of ints, sorted descending, max <= T + 1
              (as pack_padded_sequence with enforce_sorted=True expects)
    Returns packed softmax outputs of shape (sum(lengths), vocab_size).
    """
    lengths = np.asarray(lengths)
    B, T = captions.shape
    S = T + 1
    E = features.shape[1]
    H = params["w_hh"].shape[0]
    V = params["w_lin"].shape[1]
    assert np.all(lengths[:-1] >= lengths[1:]) and lengths.max() <= S, \
        "lengths must be sorted descending (pack_padded_sequence semantics)"

    # Lane/sublane-dense padded extents (batch padded to 16 for bf16 packing).
    Bp = _round_up(B, 16)
    Ep = _round_up(E, 128)
    Hp = _round_up(H, 128)
    Vp = _round_up(V, 128)
    Tc = max(1, int(time_chunk))
    Sp = _round_up(S, Tc)

    # nn.Embedding lookup (gather -- glue) + torch.cat((features.unsqueeze(1), emb), 1).
    emb = jnp.take(params["embed"], captions, axis=0)              # (B, T, E)
    x = jnp.concatenate([features[:, None, :], emb], axis=1)       # (B, S, E)
    # Time-major for leading-axis chunking in the kernel (activations are tiny;
    # this transpose is negligible next to the hoisted matmul).
    x_tm = jnp.transpose(x, (1, 0, 2))                             # (S, B, E)
    x_tm = jnp.pad(x_tm, ((0, Sp - S), (0, Bp - B), (0, Ep - E)))
    x_tm = x_tm.astype(jnp.bfloat16)

    # Per-gate zero padding keeps padded hidden units exactly zero through the
    # recurrence, so padded lanes never perturb the real ones.
    w_ih = jnp.pad(params["w_ih"].reshape(E, 4, H),
                   ((0, Ep - E), (0, 0), (0, Hp - H))).reshape(Ep, 4 * Hp)
    w_hh = jnp.pad(params["w_hh"].reshape(H, 4, H),
                   ((0, Hp - H), (0, 0), (0, Hp - H))).reshape(Hp, 4 * Hp)
    b_lstm = jnp.pad(params["b_lstm"].reshape(4, H),
                     ((0, 0), (0, Hp - H))).reshape(1, 4 * Hp)

    hiddens = lstm_pallas(x_tm, w_ih.astype(jnp.bfloat16),
                          w_hh.astype(jnp.bfloat16),
                          b_lstm.astype(jnp.float32), Tc)          # (Sp, Bp, Hp) bf16

    # pack_padded_sequence data ordering: time-major, keeping only batch
    # entries with lengths[b] > t (lengths sorted descending; padded inputs
    # only affect steps we discard, so the kept rows equal packed-LSTM rows).
    # TODO(synk): this gather could be fused into the linear kernel with a
    # PrefetchScalarGridSpec row-gather; kept as XLA glue here.
    pack_idx = np.array(
        [t * Bp + b for t in range(S) for b in range(B) if lengths[b] > t],
        dtype=np.int32)
    N = pack_idx.shape[0]
    h_packed = hiddens.reshape(Sp * Bp, Hp)[pack_idx]              # (N, Hp) bf16

    # Pad packed rows to a sublane-aligned, tileable extent; tile sized for the
    # chip's MXU width (128 on v5-class, 256 on v6e/v7x).
    N16 = _round_up(N, 16)
    tile_rows = min(N16, _default_tile_rows())
    Np = _round_up(N16, tile_rows)
    h_packed = jnp.pad(h_packed, ((0, Np - N), (0, 0)))            # stays bf16

    # Linear weights padded; padded vocab columns get -1e30 bias so their
    # softmax probability is exactly 0.
    w_lin = jnp.pad(params["w_lin"], ((0, Hp - H), (0, Vp - V))).astype(jnp.bfloat16)
    b_lin = jnp.pad(params["b_lin"].reshape(1, V), ((0, 0), (0, Vp - V)),
                    constant_values=-1e30).astype(jnp.float32)

    # Note: nn.Softmax(dim=2) applied to the 2-D packed output would raise in
    # PyTorch; softmax is applied over the vocab (last) axis as intended.
    probs = linear_softmax_pallas(h_packed, w_lin, b_lin, tile_rows)  # (Np, Vp)
    return probs[:N, :V]


# ----------------------------------------------------------------------------
# Pure-JAX reference (f32) for validation
# ----------------------------------------------------------------------------
def reference_forward(params, features, captions, lengths):
    lengths = np.asarray(lengths)
    B, T = captions.shape
    S = T + 1
    H = params["w_hh"].shape[0]
    emb = jnp.take(params["embed"], captions, axis=0)
    x = jnp.concatenate([features[:, None, :], emb], axis=1)       # (B, S, E)
    h = jnp.zeros((B, H), jnp.float32)
    c = jnp.zeros((B, H), jnp.float32)
    hs = []
    for t in range(S):
        gates = x[:, t, :] @ params["w_ih"] + h @ params["w_hh"] + params["b_lstm"]
        i_g = jax.nn.sigmoid(gates[:, 0 * H:1 * H])
        f_g = jax.nn.sigmoid(gates[:, 1 * H:2 * H])
        g_g = jnp.tanh(gates[:, 2 * H:3 * H])
        o_g = jax.nn.sigmoid(gates[:, 3 * H:4 * H])
        c = f_g * c + i_g * g_g
        h = o_g * jnp.tanh(c)
        hs.append(h)
    hiddens = jnp.stack(hs, axis=0)                                # (S, B, H)
    rows = [hiddens[t, b] for t in range(S) for b in range(B) if lengths[b] > t]
    h_packed = jnp.stack(rows, axis=0)
    logits = h_packed @ params["w_lin"] + params["b_lin"]
    return jax.nn.softmax(logits, axis=-1)


# ----------------------------------------------------------------------------
# Deterministic parameter construction
# ----------------------------------------------------------------------------
def init_params(key, embed_size, hidden_size, vocab_size):
    k = jax.random.split(key, 7)
    scale = 0.1
    # Note: b_lstm stands in for b_ih + b_hh (single tensor; numerically fine,
    # not a faithful reproduction of PyTorch's two-bias init statistics).
    return {
        # nn.Embedding(vocab_size, embed_size)
        "embed": scale * jax.random.normal(k[0], (vocab_size, embed_size), jnp.float32),
        # nn.LSTM(embed_size, hidden_size): weight_ih (4H,E) stored as (E,4H)
        "w_ih": scale * jax.random.normal(k[1], (embed_size, 4 * hidden_size), jnp.float32),
        "w_hh": scale * jax.random.normal(k[2], (hidden_size, 4 * hidden_size), jnp.float32),
        "b_lstm": scale * jax.random.normal(k[3], (1, 4 * hidden_size), jnp.float32),
        # nn.Linear(hidden_size, vocab_size): weight (V,H) stored as (H,V)
        "w_lin": scale * jax.random.normal(k[4], (hidden_size, vocab_size), jnp.float32),
        "b_lin": scale * jax.random.normal(k[5], (1, vocab_size), jnp.float32),
    }


# ----------------------------------------------------------------------------
if __name__ == "__main__":
    # Deliberately non-aligned sizes to exercise the padding + chunking paths.
    embed_size, hidden_size, vocab_size = 80, 96, 200
    B, T = 2, 7
    S = T + 1

    key = jax.random.PRNGKey(0)
    kp, kf, kc = jax.random.split(key, 3)

    params = init_params(kp, embed_size, hidden_size, vocab_size)
    features = jax.random.normal(kf, (B, embed_size), jnp.float32)
    captions = jax.random.randint(kc, (B, T), 0, vocab_size, jnp.int32)
    lengths = [S, S - 2]              # sorted descending, like pack_padded_sequence

    out = decoder_rnn_forward(params, features, captions, lengths, time_chunk=4)
    out = jax.block_until_ready(out)

    ref = reference_forward(params, features, captions, lengths)

    assert out.shape == (sum(lengths), vocab_size)
    assert bool(jnp.all(jnp.isfinite(out)))
    # rows of a softmax sum to 1 (exact normalization in the kernel)
    assert bool(jnp.allclose(jnp.sum(out, axis=-1), 1.0, atol=1e-3))
    # bf16 MXU operands + f32 accumulation vs. f32 reference
    max_err = float(jnp.max(jnp.abs(out - ref)))
    assert max_err < 5e-3, f"max abs err {max_err}"
    print("KERNEL_OK")
</pallas_src>

<mosaic_0001>
module attributes {stable_mosaic.version = 11 : i64} {
  func.func @_lstm_kernel(%arg0: i32, %arg1: memref<4x16x128xbf16, #tpu.memory_space<vmem>>, %arg2: memref<128x512xbf16, #tpu.memory_space<vmem>>, %arg3: memref<128x512xbf16, #tpu.memory_space<vmem>>, %arg4: memref<1x512xf32, #tpu.memory_space<vmem>>, %arg5: memref<4x16x128xbf16, #tpu.memory_space<vmem>>, %arg6: memref<4x16x512xf32, #tpu.memory_space<vmem>>, %arg7: memref<16x128xf32, #tpu.memory_space<vmem>>, %arg8: memref<16x128xf32, #tpu.memory_space<vmem>>) attributes {dimension_semantics = [#tpu.dimension_semantics<arbitrary>], iteration_bounds = array<i64: 2>, scalar_prefetch = 0 : i64, scratch_operands = 3 : i64, tpu.core_type = #tpu.core_type<tc>, window_params = [{transform_indices = @transform_0, window_bounds = array<i64: 4, 16, 128>}, {pipeline_mode = #tpu.pipeline_mode<synchronous>, transform_indices = @transform_1, window_bounds = array<i64: 128, 512>}, {pipeline_mode = #tpu.pipeline_mode<synchronous>, transform_indices = @transform_2, window_bounds = array<i64: 128, 512>}, {pipeline_mode = #tpu.pipeline_mode<synchronous>, transform_indices = @transform_3, window_bounds = array<i64: 1, 512>}, {transform_indices = @transform_4, window_bounds = array<i64: 4, 16, 128>}]} {
    %c0_i32 = arith.constant 0 : i32
    %0 = arith.cmpi eq, %arg0, %c0_i32 : i32
    %1 = arith.extui %0 : i1 to i32
    %c0_i32_0 = arith.constant 0 : i32
    %2 = arith.cmpi ne, %1, %c0_i32_0 : i32
    scf.if %2 {
      %cst_83 = arith.constant 0.000000e+00 : f32
      %177 = vector.broadcast %cst_83 : f32 to vector<16x128xf32>
      %c0_84 = arith.constant 0 : index
      %c0_85 = arith.constant 0 : index
      %178 = vector.load %arg7[%c0_84, %c0_85] : memref<16x128xf32, #tpu.memory_space<vmem>>, vector<16x128xf32>
      tpu.vector_store %arg7[%c0_84, %c0_85], %177 {strides = array<i32>} : memref<16x128xf32, #tpu.memory_space<vmem>>, vector<16x128xf32>,
      %cst_86 = arith.constant 0.000000e+00 : f32
      %179 = vector.broadcast %cst_86 : f32 to vector<16x128xf32>
      %c0_87 = arith.constant 0 : index
      %c0_88 = arith.constant 0 : index
      %180 = vector.load %arg8[%c0_87, %c0_88] : memref<16x128xf32, #tpu.memory_space<vmem>>, vector<16x128xf32>
      tpu.vector_store %arg8[%c0_87, %c0_88], %179 {strides = array<i32>} : memref<16x128xf32, #tpu.memory_space<vmem>>, vector<16x128xf32>,
    } else {
    }
    %c0 = arith.constant 0 : index
    %c0_1 = arith.constant 0 : index
    %c0_2 = arith.constant 0 : index
    %3 = vector.load %arg1[%c0, %c0_1, %c0_2] : memref<4x16x128xbf16, #tpu.memory_space<vmem>>, vector<4x16x128xbf16>
    %4 = vector.shape_cast %3 : vector<4x16x128xbf16> to vector<64x128xbf16>
    %c0_3 = arith.constant 0 : index
    %c0_4 = arith.constant 0 : index
    %5 = vector.load %arg2[%c0_3, %c0_4] : memref<128x512xbf16, #tpu.memory_space<vmem>>, vector<128x512xbf16>
    %cst = arith.constant dense<0.000000e+00> : vector<64x512xf32>
    %6 = tpu.matmul %4, %5, %cst {dimension_numbers = #tpu.dot_dimension_numbers<[1], [0], [0], [1], [0, 0, 1, 1], [], []>} : vector<64x128xbf16>, vector<128x512xbf16>, vector<64x512xf32> -> vector<64x512xf32>
    %7 = vector.shape_cast %6 : vector<64x512xf32> to vector<4x16x512xf32>
    %c0_5 = arith.constant 0 : index
    %c0_6 = arith.constant 0 : index
    %8 = vector.load %arg4[%c0_5, %c0_6] : memref<1x512xf32, #tpu.memory_space<vmem>>, vector<1x512xf32>
    %9 = vector.shape_cast %8 : vector<1x512xf32> to vector<1x1x512xf32>
    %10 = vector.broadcast %9 : vector<1x1x512xf32> to vector<4x16x512xf32>
    %11 = arith.addf %7, %10 : vector<4x16x512xf32>
    %c0_7 = arith.constant 0 : index
    %c0_8 = arith.constant 0 : index
    %c0_9 = arith.constant 0 : index
    %12 = vector.load %arg6[%c0_7, %c0_8, %c0_9] : memref<4x16x512xf32, #tpu.memory_space<vmem>>, vector<4x16x512xf32>
    tpu.vector_store %arg6[%c0_7, %c0_8, %c0_9], %11 {strides = array<i32>} : memref<4x16x512xf32, #tpu.memory_space<vmem>>, vector<4x16x512xf32>,
    %c0_i32_10 = arith.constant 0 : i32
    %13 = arith.index_cast %c0_i32_10 : i32 to index
    %c0_11 = arith.constant 0 : index
    %c0_12 = arith.constant 0 : index
    %14 = vector.load %arg6[%13, %c0_11, %c0_12] : memref<4x16x512xf32, #tpu.memory_space<vmem>>, vector<1x16x512xf32>
    %15 = vector.shape_cast %14 : vector<1x16x512xf32> to vector<16x512xf32>
    %c0_13 = arith.constant 0 : index
    %c0_14 = arith.constant 0 : index
    %16 = vector.load %arg7[%c0_13, %c0_14] : memref<16x128xf32, #tpu.memory_space<vmem>>, vector<16x128xf32>
    %17 = arith.truncf %16 : vector<16x128xf32> to vector<16x128xbf16>
    %c0_15 = arith.constant 0 : index
    %c0_16 = arith.constant 0 : index
    %18 = vector.load %arg3[%c0_15, %c0_16] : memref<128x512xbf16, #tpu.memory_space<vmem>>, vector<128x512xbf16>
    %cst_17 = arith.constant dense<0.000000e+00> : vector<16x512xf32>
    %19 = tpu.matmul %17, %18, %cst_17 {dimension_numbers = #tpu.dot_dimension_numbers<[1], [0], [0], [1], [0, 0, 1, 1], [], []>} : vector<16x128xbf16>, vector<128x512xbf16>, vector<16x512xf32> -> vector<16x512xf32>
    %20 = arith.addf %15, %19 : vector<16x512xf32>
    %21 = vector.extract_strided_slice %20 {offsets = [0, 0], sizes = [16, 128], strides = [1, 1]} : vector<16x512xf32> to vector<16x128xf32>
    %22 = arith.negf %21 : vector<16x128xf32>
    %23 = math.exp %22 : vector<16x128xf32>
    %cst_18 = arith.constant 1.000000e+00 : f32
    %24 = vector.broadcast %cst_18 : f32 to vector<16x128xf32>
    %25 = arith.addf %24, %23 : vector<16x128xf32>
    %26 = arith.divf %24, %25 : vector<16x128xf32>
    %27 = vector.extract_strided_slice %20 {offsets = [0, 128], sizes = [16, 128], strides = [1, 1]} : vector<16x512xf32> to vector<16x128xf32>
    %28 = arith.negf %27 : vector<16x128xf32>
    %29 = math.exp %28 : vector<16x128xf32>
    %cst_19 = arith.constant 1.000000e+00 : f32
    %30 = vector.broadcast %cst_19 : f32 to vector<16x128xf32>
    %31 = arith.addf %30, %29 : vector<16x128xf32>
    %32 = arith.divf %30, %31 : vector<16x128xf32>
    %33 = vector.extract_strided_slice %20 {offsets = [0, 256], sizes = [16, 128], strides = [1, 1]} : vector<16x512xf32> to vector<16x128xf32>
    %34 = math.tanh %33 : vector<16x128xf32>
    %35 = vector.extract_strided_slice %20 {offsets = [0, 384], sizes = [16, 128], strides = [1, 1]} : vector<16x512xf32> to vector<16x128xf32>
    %36 = arith.negf %35 : vector<16x128xf32>
    %37 = math.exp %36 : vector<16x128xf32>
    %cst_20 = arith.constant 1.000000e+00 : f32
    %38 = vector.broadcast %cst_20 : f32 to vector<16x128xf32>
    %39 = arith.addf %38, %37 : vector<16x128xf32>
    %40 = arith.divf %38, %39 : vector<16x128xf32>
    %c0_21 = arith.constant 0 : index
    %c0_22 = arith.constant 0 : index
    %41 = vector.load %arg8[%c0_21, %c0_22] : memref<16x128xf32, #tpu.memory_space<vmem>>, vector<16x128xf32>
    %42 = arith.mulf %32, %41 : vector<16x128xf32>
    %43 = arith.mulf %26, %34 : vector<16x128xf32>
    %44 = arith.addf %42, %43 : vector<16x128xf32>
    %45 = math.tanh %44 : vector<16x128xf32>
    %46 = arith.mulf %40, %45 : vector<16x128xf32>
    %c0_23 = arith.constant 0 : index
    %c0_24 = arith.constant 0 : index
    %47 = vector.load %arg8[%c0_23, %c0_24] : memref<16x128xf32, #tpu.memory_space<vmem>>, vector<16x128xf32>
    tpu.vector_store %arg8[%c0_23, %c0_24], %44 {strides = array<i32>} : memref<16x128xf32, #tpu.memory_space<vmem>>, vector<16x128xf32>,
    %c0_25 = arith.constant 0 : index
    %c0_26 = arith.constant 0 : index
    %48 = vector.load %arg7[%c0_25, %c0_26] : memref<16x128xf32, #tpu.memory_space<vmem>>, vector<16x128xf32>
    tpu.vector_store %arg7[%c0_25, %c0_26], %46 {strides = array<i32>} : memref<16x128xf32, #tpu.memory_space<vmem>>, vector<16x128xf32>,
    %49 = arith.truncf %46 : vector<16x128xf32> to vector<16x128xbf16>
    %50 = arith.index_cast %c0_i32_10 : i32 to index
    %c0_27 = arith.constant 0 : index
    %c0_28 = arith.constant 0 : index
    %51 = vector.load %arg5[%50, %c0_27, %c0_28] : memref<4x16x128xbf16, #tpu.memory_space<vmem>>, vector<1x16x128xbf16>
    %52 = vector.shape_cast %51 : vector<1x16x128xbf16> to vector<16x128xbf16>
    %53 = vector.shape_cast %49 : vector<16x128xbf16> to vector<1x16x128xbf16>
    tpu.vector_store %arg5[%50, %c0_27, %c0_28], %53 {strides = array<i32>} : memref<4x16x128xbf16, #tpu.memory_space<vmem>>, vector<1x16x128xbf16>,
    %c1_i32 = arith.constant 1 : i32
    %54 = arith.index_cast %c1_i32 : i32 to index
    %c0_29 = arith.constant 0 : index
    %c0_30 = arith.constant 0 : index
    %55 = vector.load %arg6[%54, %c0_29, %c0_30] : memref<4x16x512xf32, #tpu.memory_space<vmem>>, vector<1x16x512xf32>
    %56 = vector.shape_cast %55 : vector<1x16x512xf32> to vector<16x512xf32>
    %c0_31 = arith.constant 0 : index
    %c0_32 = arith.constant 0 : index
    %57 = vector.load %arg7[%c0_31, %c0_32] : memref<16x128xf32, #tpu.memory_space<vmem>>, vector<16x128xf32>
    %58 = arith.truncf %57 : vector<16x128xf32> to vector<16x128xbf16>
    %c0_33 = arith.constant 0 : index
    %c0_34 = arith.constant 0 : index
    %59 = vector.load %arg3[%c0_33, %c0_34] : memref<128x512xbf16, #tpu.memory_space<vmem>>, vector<128x512xbf16>
    %cst_35 = arith.constant dense<0.000000e+00> : vector<16x512xf32>
    %60 = tpu.matmul %58, %59, %cst_35 {dimension_numbers = #tpu.dot_dimension_numbers<[1], [0], [0], [1], [0, 0, 1, 1], [], []>} : vector<16x128xbf16>, vector<128x512xbf16>, vector<16x512xf32> -> vector<16x512xf32>
    %61 = arith.addf %56, %60 : vector<16x512xf32>
    %62 = vector.extract_strided_slice %61 {offsets = [0, 0], sizes = [16, 128], strides = [1, 1]} : vector<16x512xf32> to vector<16x128xf32>
    %63 = arith.negf %62 : vector<16x128xf32>
    %64 = math.exp %63 : vector<16x128xf32>
    %cst_36 = arith.constant 1.000000e+00 : f32
    %65 = vector.broadcast %cst_36 : f32 to vector<16x128xf32>
    %66 = arith.addf %65, %64 : vector<16x128xf32>
    %67 = arith.divf %65, %66 : vector<16x128xf32>
    %68 = vector.extract_strided_slice %61 {offsets = [0, 128], sizes = [16, 128], strides = [1, 1]} : vector<16x512xf32> to vector<16x128xf32>
    %69 = arith.negf %68 : vector<16x128xf32>
    %70 = math.exp %69 : vector<16x128xf32>
    %cst_37 = arith.constant 1.000000e+00 : f32
    %71 = vector.broadcast %cst_37 : f32 to vector<16x128xf32>
    %72 = arith.addf %71, %70 : vector<16x128xf32>
    %73 = arith.divf %71, %72 : vector<16x128xf32>
    %74 = vector.extract_strided_slice %61 {offsets = [0, 256], sizes = [16, 128], strides = [1, 1]} : vector<16x512xf32> to vector<16x128xf32>
    %75 = math.tanh %74 : vector<16x128xf32>
    %76 = vector.extract_strided_slice %61 {offsets = [0, 384], sizes = [16, 128], strides = [1, 1]} : vector<16x512xf32> to vector<16x128xf32>
    %77 = arith.negf %76 : vector<16x128xf32>
    %78 = math.exp %77 : vector<16x128xf32>
    %cst_38 = arith.constant 1.000000e+00 : f32
    %79 = vector.broadcast %cst_38 : f32 to vector<16x128xf32>
    %80 = arith.addf %79, %78 : vector<16x128xf32>
    %81 = arith.divf %79, %80 : vector<16x128xf32>
    %c0_39 = arith.constant 0 : index
    %c0_40 = arith.constant 0 : index
    %82 = vector.load %arg8[%c0_39, %c0_40] : memref<16x128xf32, #tpu.memory_space<vmem>>, vector<16x128xf32>
    %83 = arith.mulf %73, %82 : vector<16x128xf32>
    %84 = arith.mulf %67, %75 : vector<16x128xf32>
    %85 = arith.addf %83, %84 : vector<16x128xf32>
    %86 = math.tanh %85 : vector<16x128xf32>
    %87 = arith.mulf %81, %86 : vector<16x128xf32>
    %c0_41 = arith.constant 0 : index
    %c0_42 = arith.constant 0 : index
    %88 = vector.load %arg8[%c0_41, %c0_42] : memref<16x128xf32, #tpu.memory_space<vmem>>, vector<16x128xf32>
    tpu.vector_store %arg8[%c0_41, %c0_42], %85 {strides = array<i32>} : memref<16x128xf32, #tpu.memory_space<vmem>>, vector<16x128xf32>,
    %c0_43 = arith.constant 0 : index
    %c0_44 = arith.constant 0 : index
    %89 = vector.load %arg7[%c0_43, %c0_44] : memref<16x128xf32, #tpu.memory_space<vmem>>, vector<16x128xf32>
    tpu.vector_store %arg7[%c0_43, %c0_44], %87 {strides = array<i32>} : memref<16x128xf32, #tpu.memory_space<vmem>>, vector<16x128xf32>,
    %90 = arith.truncf %87 : vector<16x128xf32> to vector<16x128xbf16>
    %91 = arith.index_cast %c1_i32 : i32 to index
    %c0_45 = arith.constant 0 : index
    %c0_46 = arith.constant 0 : index
    %92 = vector.load %arg5[%91, %c0_45, %c0_46] : memref<4x16x128xbf16, #tpu.memory_space<vmem>>, vector<1x16x128xbf16>
    %93 = vector.shape_cast %92 : vector<1x16x128xbf16> to vector<16x128xbf16>
    %94 = vector.shape_cast %90 : vector<16x128xbf16> to vector<1x16x128xbf16>
    tpu.vector_store %arg5[%91, %c0_45, %c0_46], %94 {strides = array<i32>} : memref<4x16x128xbf16, #tpu.memory_space<vmem>>, vector<1x16x128xbf16>,
    %c2_i32 = arith.constant 2 : i32
    %95 = arith.index_cast %c2_i32 : i32 to index
    %c0_47 = arith.constant 0 : index
    %c0_48 = arith.constant 0 : index
    %96 = vector.load %arg6[%95, %c0_47, %c0_48] : memref<4x16x512xf32, #tpu.memory_space<vmem>>, vector<1x16x512xf32>
    %97 = vector.shape_cast %96 : vector<1x16x512xf32> to vector<16x512xf32>
    %c0_49 = arith.constant 0 : index
    %c0_50 = arith.constant 0 : index
    %98 = vector.load %arg7[%c0_49, %c0_50] : memref<16x128xf32, #tpu.memory_space<vmem>>, vector<16x128xf32>
    %99 = arith.truncf %98 : vector<16x128xf32> to vector<16x128xbf16>
    %c0_51 = arith.constant 0 : index
    %c0_52 = arith.constant 0 : index
    %100 = vector.load %arg3[%c0_51, %c0_52] : memref<128x512xbf16, #tpu.memory_space<vmem>>, vector<128x512xbf16>
    %cst_53 = arith.constant dense<0.000000e+00> : vector<16x512xf32>
    %101 = tpu.matmul %99, %100, %cst_53 {dimension_numbers = #tpu.dot_dimension_numbers<[1], [0], [0], [1], [0, 0, 1, 1], [], []>} : vector<16x128xbf16>, vector<128x512xbf16>, vector<16x512xf32> -> vector<16x512xf32>
    %102 = arith.addf %97, %101 : vector<16x512xf32>
    %103 = vector.extract_strided_slice %102 {offsets = [0, 0], sizes = [16, 128], strides = [1, 1]} : vector<16x512xf32> to vector<16x128xf32>
    %104 = arith.negf %103 : vector<16x128xf32>
    %105 = math.exp %104 : vector<16x128xf32>
    %cst_54 = arith.constant 1.000000e+00 : f32
    %106 = vector.broadcast %cst_54 : f32 to vector<16x128xf32>
    %107 = arith.addf %106, %105 : vector<16x128xf32>
    %108 = arith.divf %106, %107 : vector<16x128xf32>
    %109 = vector.extract_strided_slice %102 {offsets = [0, 128], sizes = [16, 128], strides = [1, 1]} : vector<16x512xf32> to vector<16x128xf32>
    %110 = arith.negf %109 : vector<16x128xf32>
    %111 = math.exp %110 : vector<16x128xf32>
    %cst_55 = arith.constant 1.000000e+00 : f32
    %112 = vector.broadcast %cst_55 : f32 to vector<16x128xf32>
    %113 = arith.addf %112, %111 : vector<16x128xf32>
    %114 = arith.divf %112, %113 : vector<16x128xf32>
    %115 = vector.extract_strided_slice %102 {offsets = [0, 256], sizes = [16, 128], strides = [1, 1]} : vector<16x512xf32> to vector<16x128xf32>
    %116 = math.tanh %115 : vector<16x128xf32>
    %117 = vector.extract_strided_slice %102 {offsets = [0, 384], sizes = [16, 128], strides = [1, 1]} : vector<16x512xf32> to vector<16x128xf32>
    %118 = arith.negf %117 : vector<16x128xf32>
    %119 = math.exp %118 : vector<16x128xf32>
    %cst_56 = arith.constant 1.000000e+00 : f32
    %120 = vector.broadcast %cst_56 : f32 to vector<16x128xf32>
    %121 = arith.addf %120, %119 : vector<16x128xf32>
    %122 = arith.divf %120, %121 : vector<16x128xf32>
    %c0_57 = arith.constant 0 : index
    %c0_58 = arith.constant 0 : index
    %123 = vector.load %arg8[%c0_57, %c0_58] : memref<16x128xf32, #tpu.memory_space<vmem>>, vector<16x128xf32>
    %124 = arith.mulf %114, %123 : vector<16x128xf32>
    %125 = arith.mulf %108, %116 : vector<16x128xf32>
    %126 = arith.addf %124, %125 : vector<16x128xf32>
    %127 = math.tanh %126 : vector<16x128xf32>
    %128 = arith.mulf %122, %127 : vector<16x128xf32>
    %c0_59 = arith.constant 0 : index
    %c0_60 = arith.constant 0 : index
    %129 = vector.load %arg8[%c0_59, %c0_60] : memref<16x128xf32, #tpu.memory_space<vmem>>, vector<16x128xf32>
    tpu.vector_store %arg8[%c0_59, %c0_60], %126 {strides = array<i32>} : memref<16x128xf32, #tpu.memory_space<vmem>>, vector<16x128xf32>,
    %c0_61 = arith.constant 0 : index
    %c0_62 = arith.constant 0 : index
    %130 = vector.load %arg7[%c0_61, %c0_62] : memref<16x128xf32, #tpu.memory_space<vmem>>, vector<16x128xf32>
    tpu.vector_store %arg7[%c0_61, %c0_62], %128 {strides = array<i32>} : memref<16x128xf32, #tpu.memory_space<vmem>>, vector<16x128xf32>,
    %131 = arith.truncf %128 : vector<16x128xf32> to vector<16x128xbf16>
    %132 = arith.index_cast %c2_i32 : i32 to index
    %c0_63 = arith.constant 0 : index
    %c0_64 = arith.constant 0 : index
    %133 = vector.load %arg5[%132, %c0_63, %c0_64] : memref<4x16x128xbf16, #tpu.memory_space<vmem>>, vector<1x16x128xbf16>
    %134 = vector.shape_cast %133 : vector<1x16x128xbf16> to vector<16x128xbf16>
    %135 = vector.shape_cast %131 : vector<16x128xbf16> to vector<1x16x128xbf16>
    tpu.vector_store %arg5[%132, %c0_63, %c0_64], %135 {strides = array<i32>} : memref<4x16x128xbf16, #tpu.memory_space<vmem>>, vector<1x16x128xbf16>,
    %c3_i32 = arith.constant 3 : i32
    %136 = arith.index_cast %c3_i32 : i32 to index
    %c0_65 = arith.constant 0 : index
    %c0_66 = arith.constant 0 : index
    %137 = vector.load %arg6[%136, %c0_65, %c0_66] : memref<4x16x512xf32, #tpu.memory_space<vmem>>, vector<1x16x512xf32>
    %138 = vector.shape_cast %137 : vector<1x16x512xf32> to vector<16x512xf32>
    %c0_67 = arith.constant 0 : index
    %c0_68 = arith.constant 0 : index
    %139 = vector.load %arg7[%c0_67, %c0_68] : memref<16x128xf32, #tpu.memory_space<vmem>>, vector<16x128xf32>
    %140 = arith.truncf %139 : vector<16x128xf32> to vector<16x128xbf16>
    %c0_69 = arith.constant 0 : index
    %c0_70 = arith.constant 0 : index
    %141 = vector.load %arg3[%c0_69, %c0_70] : memref<128x512xbf16, #tpu.memory_space<vmem>>, vector<128x512xbf16>
    %cst_71 = arith.constant dense<0.000000e+00> : vector<16x512xf32>
    %142 = tpu.matmul %140, %141, %cst_71 {dimension_numbers = #tpu.dot_dimension_numbers<[1], [0], [0], [1], [0, 0, 1, 1], [], []>} : vector<16x128xbf16>, vector<128x512xbf16>, vector<16x512xf32> -> vector<16x512xf32>
    %143 = arith.addf %138, %142 : vector<16x512xf32>
    %144 = vector.extract_strided_slice %143 {offsets = [0, 0], sizes = [16, 128], strides = [1, 1]} : vector<16x512xf32> to vector<16x128xf32>
    %145 = arith.negf %144 : vector<16x128xf32>
    %146 = math.exp %145 : vector<16x128xf32>
    %cst_72 = arith.constant 1.000000e+00 : f32
    %147 = vector.broadcast %cst_72 : f32 to vector<16x128xf32>
    %148 = arith.addf %147, %146 : vector<16x128xf32>
    %149 = arith.divf %147, %148 : vector<16x128xf32>
    %150 = vector.extract_strided_slice %143 {offsets = [0, 128], sizes = [16, 128], strides = [1, 1]} : vector<16x512xf32> to vector<16x128xf32>
    %151 = arith.negf %150 : vector<16x128xf32>
    %152 = math.exp %151 : vector<16x128xf32>
    %cst_73 = arith.constant 1.000000e+00 : f32
    %153 = vector.broadcast %cst_73 : f32 to vector<16x128xf32>
    %154 = arith.addf %153, %152 : vector<16x128xf32>
    %155 = arith.divf %153, %154 : vector<16x128xf32>
    %156 = vector.extract_strided_slice %143 {offsets = [0, 256], sizes = [16, 128], strides = [1, 1]} : vector<16x512xf32> to vector<16x128xf32>
    %157 = math.tanh %156 : vector<16x128xf32>
    %158 = vector.extract_strided_slice %143 {offsets = [0, 384], sizes = [16, 128], strides = [1, 1]} : vector<16x512xf32> to vector<16x128xf32>
    %159 = arith.negf %158 : vector<16x128xf32>
    %160 = math.exp %159 : vector<16x128xf32>
    %cst_74 = arith.constant 1.000000e+00 : f32
    %161 = vector.broadcast %cst_74 : f32 to vector<16x128xf32>
    %162 = arith.addf %161, %160 : vector<16x128xf32>
    %163 = arith.divf %161, %162 : vector<16x128xf32>
    %c0_75 = arith.constant 0 : index
    %c0_76 = arith.constant 0 : index
    %164 = vector.load %arg8[%c0_75, %c0_76] : memref<16x128xf32, #tpu.memory_space<vmem>>, vector<16x128xf32>
    %165 = arith.mulf %155, %164 : vector<16x128xf32>
    %166 = arith.mulf %149, %157 : vector<16x128xf32>
    %167 = arith.addf %165, %166 : vector<16x128xf32>
    %168 = math.tanh %167 : vector<16x128xf32>
    %169 = arith.mulf %163, %168 : vector<16x128xf32>
    %c0_77 = arith.constant 0 : index
    %c0_78 = arith.constant 0 : index
    %170 = vector.load %arg8[%c0_77, %c0_78] : memref<16x128xf32, #tpu.memory_space<vmem>>, vector<16x128xf32>
    tpu.vector_store %arg8[%c0_77, %c0_78], %167 {strides = array<i32>} : memref<16x128xf32, #tpu.memory_space<vmem>>, vector<16x128xf32>,
    %c0_79 = arith.constant 0 : index
    %c0_80 = arith.constant 0 : index
    %171 = vector.load %arg7[%c0_79, %c0_80] : memref<16x128xf32, #tpu.memory_space<vmem>>, vector<16x128xf32>
    tpu.vector_store %arg7[%c0_79, %c0_80], %169 {strides = array<i32>} : memref<16x128xf32, #tpu.memory_space<vmem>>, vector<16x128xf32>,
    %172 = arith.truncf %169 : vector<16x128xf32> to vector<16x128xbf16>
    %173 = arith.index_cast %c3_i32 : i32 to index
    %c0_81 = arith.constant 0 : index
    %c0_82 = arith.constant 0 : index
    %174 = vector.load %arg5[%173, %c0_81, %c0_82] : memref<4x16x128xbf16, #tpu.memory_space<vmem>>, vector<1x16x128xbf16>
    %175 = vector.shape_cast %174 : vector<1x16x128xbf16> to vector<16x128xbf16>
    %176 = vector.shape_cast %172 : vector<16x128xbf16> to vector<1x16x128xbf16>
    tpu.vector_store %arg5[%173, %c0_81, %c0_82], %176 {strides = array<i32>} : memref<4x16x128xbf16, #tpu.memory_space<vmem>>, vector<1x16x128xbf16>,
    %c4_i32 = arith.constant 4 : i32
    return
  }
  func.func @transform_0(%arg0: i32) -> (i32, i32, i32) {
    %c0_i32 = arith.constant 0 : i32
    %c0_i32_0 = arith.constant 0 : i32
    %c0_i32_1 = arith.constant 0 : i32
    return %arg0, %c0_i32, %c0_i32_0 : i32, i32, i32
  }
  func.func @transform_1(%arg0: i32) -> (i32, i32) {
    %c0_i32 = arith.constant 0 : i32
    %c0_i32_0 = arith.constant 0 : i32
    %c0_i32_1 = arith.constant 0 : i32
    return %c0_i32, %c0_i32_0 : i32, i32
  }
  func.func @transform_2(%arg0: i32) -> (i32, i32) {
    %c0_i32 = arith.constant 0 : i32
    %c0_i32_0 = arith.constant 0 : i32
    %c0_i32_1 = arith.constant 0 : i32
    return %c0_i32, %c0_i32_0 : i32, i32
  }
  func.func @transform_3(%arg0: i32) -> (i32, i32) {
    %c0_i32 = arith.constant 0 : i32
    %c0_i32_0 = arith.constant 0 : i32
    %c0_i32_1 = arith.constant 0 : i32
    return %c0_i32, %c0_i32_0 : i32, i32
  }
  func.func @transform_4(%arg0: i32) -> (i32, i32, i32) {
    %c0_i32 = arith.constant 0 : i32
    %c0_i32_0 = arith.constant 0 : i32
    %c0_i32_1 = arith.constant 0 : i32
    return %arg0, %c0_i32, %c0_i32_0 : i32, i32, i32
  }
}

</mosaic_0001>

<bundles_post_ra>
// kernel: tpu_custom_call.1
= control target key start
LH: loop header
LB: loop body
LE: loop exit
PB: predicated region body
PF: predicated region fallthrough
CT: control target
= control target key end

     0   :  { %9 = vsyncpa [#allocation6], 0  ;;  %s3589_s0 = inlined_call_operand.hbm [shape: bf16[8,16,128], index: 0, kind: input, shape index: {}]   ;;  %s3590_s1 = inlined_call_operand.hbm [shape: bf16[128,512], index: 1, kind: input, shape index: {}]   ;;  %s3591_s2 = inlined_call_operand.hbm [shape: bf16[128,512], index: 2, kind: input, shape index: {}]   ;;  %s3592_s3 = inlined_call_operand.vmem [shape: f32[1,512], index: 3, kind: input, shape index: {}]   ;;  %s3593_s4 = inlined_call_operand.hbm [shape: bf16[8,16,128], index: 4, kind: output, shape index: {}]  }
   0x1   :  { %11 = vsyncpa [#allocation6 + $0x1], 0 }
   0x2   :  { %12 = vsyncpa [#allocation9], 0 }
   0x3   :  { %13 = vsyncpa [#allocation7], 0 }
   0x4   :  { %15 = vsyncpa [#allocation7 + $0x1], 0  ;;  %s3066_s15 = smov 0   ;;  %s3068_s16 = smov 0  }
   0x5   :  { %s3070_s17 = smov 0   ;;  %s3072_s18 = smov 0  }
   0x6 LB: > { %s3087_s19 = sadd.s32 4294967295, %s3027_s18   ;;  %s2270_s20 = sadd.s32 4294967294, %s3027_s18   ;;  %s3027_s18 = sphi %s3072_s18, %s3655_s18   ;;  %s3023_s17 = sphi %s3070_s17, %s3654_s17   ;;  %s3019_s16 = sphi %s3068_s16, %s3653_s16   ;;  %s3015_s15 = sphi %s3066_s15, %s3652_s15  }
   0x7   : > { %p41_p0 = scmp.ne.s32.totalorder %s3019_s16, %s3015_s15  ;;  %p3594_p1 = scmp.eq.s32.totalorder %s3087_s19, 0 }
   0x8   : > { %p134_p3 = scmp.eq.s32.totalorder %s2270_s20, 1  ;;  %p2271_p5 = scmp.ge.s32.totalorder %s3027_s18, 1 }
   0x9   : > { %p3096_p4 = por %p3594_p1, %p41_p0  ;;  %p141_p7 = scmp.lt.s32.totalorder %s3027_s18, 3 }
   0xa   : > { %p3101_p6 = por %p134_p3, %p41_p0  ;;  %s3029_s24 = smov [#allocation8]  }
   0xb   : > { %s3600_s21 = scalar_select %p3096_p4, 1, 0 }
   0xc   : > { %s3601_s22 = scalar_select %p3101_p6, 1, 0 }
   0xd   : > { %p3107_p9 = pnand %p2271_p5, %p141_p7  ;;  %s153_s25 = sshll.u32 %s3029_s24, 4  ;;  %s154_s25 = int_to_ptr.vmem [resolvable:$true] %s153_s25 }
   0xe   : > { %s3030_s27 = smov [#allocation10]   ;;  %s2890_s29 = scalar_lea.vmem %s154_s25, 4096 }
   0xf   : > { %s3602_s23 = scalar_select %p3107_p9, 1, 0 }
  0x10   : > { %p2540_p10 = pneg %p3107_p9  ;;  %s166_s28 = sshll.u32 %s3030_s27, 4  ;;  %s167_s28 = int_to_ptr.vmem [resolvable:$true] %s166_s28 }
  0x11   : > { %p2891_p0 = scmp.ne.s32.totalorder %s154_s25, %s2890_s29  ;;  %p2898_p7 = scmp.lt.s32.totalorder %s154_s25, %s154_s25 }
  0x12   : > { %p3116_p12 = pnand %p2540_p10, %p3594_p1  ;;  %p2899_p11 = scmp.lt.s32.totalorder %s2890_s29, %s2890_s29 }
  0x14   : > { %p2881_p13 = pneg %p3116_p12  ;;  %p2900_p8 = por %p2899_p11, %p2898_p7 }
  0x16   : > { %p2893_p3 = pnand %p2891_p0, %p2881_p13 }
  0x18   : > { %p2894_p5 = pneg %p2893_p3 }
  0x1a   : > { %p2901_p10 = pnand %p2900_p8, %p2894_p5 }
  0x1c   : > { %2904 = shalt.err (!%p2901_p10)
}
  0x1d   : > { %s3031_s30 = smov 256   ;;  %s3032_s5 = smov 16  }
  0x1e   : > { %2543 = dma.hbm_to_vmem [thread:$0]  (!%p3116_p12), %s3590_s1, 4096, %s154_s25, [#allocation9], %s3031_s30, %s3031_s30, %s3032_s5  }
  0x1f   : > { %s2916_s8 = scalar_lea.vmem %s167_s28, 4096  ;;  %p2924_p2 = scmp.lt.s32.totalorder %s167_s28, %s167_s28 }
  0x20   : > { %p2917_p1 = scmp.ne.s32.totalorder %s167_s28, %s2916_s8  ;;  %p2925_p6 = scmp.lt.s32.totalorder %s2916_s8, %s2916_s8 }
  0x22   : > { %p2919_p0 = pnand %p2917_p1, %p2881_p13  ;;  %p2926_p11 = por %p2925_p6, %p2924_p2 }
  0x24   : > { %p2920_p3 = pneg %p2919_p0 }
  0x26   : > { %p2927_p8 = pnand %p2926_p11, %p2920_p3 }
  0x28   : > { %2930 = shalt.err (!%p2927_p8)
}
  0x29   : > { %2546 = dma.hbm_to_vmem [thread:$0]  (!%p3116_p12), %s3591_s2, 4096, %s167_s28, [#allocation9], %s3031_s30, %s3031_s30, %s3032_s5  }
  0x2a   : > { %s3139_s11 = sadd.s32 1, %s3027_s18   ;;  %s28_s12 = sadd.s32 1, %s3023_s17 }
  0x2b   : > { %s25_s13 = ssub.s32 %s3027_s18, %s3139_s11  ;;  %p35_p1 = scmp.ne.s32.totalorder %s3023_s17, %s3019_s16 }
  0x2c   : > { %p26_p2 = scmp.eq.s32.totalorder %s25_s13, 0  ;;  %p36_p6 = scmp.eq.s32.totalorder %s3027_s18, 0 }
  0x2d   : > { %p3604_p13 = scmp.eq.s32.totalorder %s3087_s19, 1  ;;  %p2557_p7 = scmp.lt.s32.totalorder %s3027_s18, 2 }
  0x2e   : > { %s3155_s20 = scalar_select %p26_p2, %s3023_s17, %s28_s12  }
  0x2f   : > { %p3149_p5 = por %p3604_p13, %p35_p1  ;;  %p37_p10 = por %p36_p6, %p35_p1 }
  0x30   : > { %s183_s24 = sand.u32 1, %s3023_s17   ;;  %s2494_s26 = sshll.u32 %s3027_s18, 9 }
  0x31   : > { %s3605_s14 = scalar_select %p3149_p5, 1, 0 }
  0x32   : > { %s2275_s25 = sshll.u32 %s183_s24, 5  ;;  %s3162_s29 = scalar_lea.hbm %s3589_s0, %s2494_s26 }
  0x33   : > { %s187_s30 = scalar_lea.vmem [#allocation5], %s2275_s25  ;;  %p3166_p12 = pnand %p2557_p7, %p37_p10 }
  0x34   : > { %s195_s5 = sshll.u32 %s187_s30, 4  ;;  %s3170_s7 = scalar_lea.sflag [#allocation6], %s183_s24  ;;  %s3164_s5 = int_to_ptr.vmem [resolvable:$true] %s195_s5 }
  0x35   : > { %s2931_s8 = scalar_lea.hbm %s3162_s29, 512  ;;  %p2933_p3 = pneg %p3166_p12 }
  0x36   : > { %p2932_p0 = scmp.ne.s32.totalorder %s3162_s29, %s2931_s8  ;;  %s2936_s12 = scalar_lea.hbm %s3589_s0, 1024 }
  0x37   : > { %p2937_p1 = scmp.lt.s32.totalorder %s3162_s29, %s3589_s0  ;;  %p2938_p2 = scmp.lt.s32.totalorder %s2936_s12, %s2931_s8 }
  0x38   : > { %p2934_p11 = pnand %p2933_p3, %p2932_p0 }
  0x39   : > { %p2939_p6 = por %p2938_p2, %p2937_p1 }
  0x3a   : > { %p2935_p8 = pneg %p2934_p11 }
  0x3c   : > { %p2940_p13 = pnand %p2939_p6, %p2935_p8 }
  0x3e   : > { %2943 = shalt.err (!%p2940_p13)
}
  0x3f   : > { %s2944_s24 = scalar_lea.vmem %s3164_s5, 512  ;;  %s3033_s26 = smov [#allocation5]  }
  0x40   : > { %p2945_p7 = scmp.ne.s32.totalorder %s3164_s5, %s2944_s24  ;;  %s2949_s27 = sshll.u32 %s3033_s26, 4  ;;  %s2950_s27 = int_to_ptr.vmem [resolvable:$false] %s2949_s27 }
  0x41   : > { %s2951_s28 = scalar_lea.vmem %s2950_s27, 1024  ;;  %p2952_p11 = scmp.lt.s32.totalorder %s3164_s5, %s2950_s27 }
  0x42   : > { %p2947_p10 = pnand %p2945_p7, %p2933_p3  ;;  %p2953_p5 = scmp.lt.s32.totalorder %s2951_s28, %s2944_s24 }
  0x44   : > { %p2948_p0 = pneg %p2947_p10  ;;  %p2954_p4 = por %p2953_p5, %p2952_p11 }
  0x46   : > { %p2955_p9 = pnand %p2954_p4, %p2948_p0 }
  0x48   : > { %2958 = shalt.err (!%p2955_p9)
}
  0x49   : > { %s3034_s30 = smov 64   ;;  %s3035_s8 = smov 4  }
  0x4a   : > { %2550 = dma.hbm_to_vmem [thread:$0]  (!%p3166_p12), %s3162_s29, 512, %s3164_s5, %s3170_s7, %s3034_s30, %s3034_s30, %s3035_s8  }
  0x4b   : > { %p3607_p3 = scmp.ne.s32.totalorder %s3602_s23, 0 }
  0x4d   : > { %207 = sbr.rel (%p3607_p3) target bundleno = 1199 (0x4af), region = 36 }
  0x52   : > { %s3194_s9 = sand.u32 1, %s3019_s16   ;;  %p3608_p4 = scmp.ne.s32.totalorder %s3600_s21, 0 }
  0x53   : > { %s2280_s10 = sshll.u32 %s3194_s9, 5  ;;  %s210_s12 = scalar_lea.sflag [#allocation6], %s3194_s9 }
  0x54   : > { %s3198_s13 = scalar_lea.vmem [#allocation5], %s2280_s10 }
  0x55   : > { %3002 = dma.done.wait (%p3608_p4), %s210_s12, 512  }
  0x56   : > { %3004 = vsyncadd (%p3608_p4), %s210_s12, 4294966784  ;;  %p3609_p9 = scmp.eq.s32.totalorder %s3087_s19, 0 }
  0x58   : > { %3006 = dma.done.wait (%p3609_p9), [#allocation9], 8192   ;;  %p3610_p5 = pmov %p3609_p9 }
  0x59   : > { %s3208_s23 = scalar_lea.vmem [#allocation11], %s2280_s10  ;;  %p3611_p12 = scmp.ne.s32.totalorder %s3087_s19, 0 }
  0x5a   : > { %3008 = vsyncadd (%p3610_p5), [#allocation9], 4294959104 }
  0x5b   : > { %252 = sbr.rel (%p3611_p12) target bundleno = 99 (0x63), region = 52 }
  0x60   : > { %v3036_v0 = vmov 0.0  }
  0x61   : > { %253 = vst [vmem:[#allocation3] sm:$0xff] %v3036_v0  ;;  %254 = vst [vmem:[#allocation3 + $0x8] sm:$0xff] %v3036_v0 }
  0x62   : > { %255 = vst [vmem:[#allocation4 + $0x8] sm:$0xff] %v3036_v0  ;;  %256 = vst [vmem:[#allocation4] sm:$0xff] %v3036_v0 }
  0x63 PF: > { %v2603_v1 = vld [vmem:[#allocation8 + $0xe4] ss:$16 sps:$4 sm:$0xff]   ;;  %v2605_v2 = vld [vmem:[#allocation8 + $0xec] ss:$16 sps:$4 sm:$0xff]   ;;  %v3598_v3 = vmov 0   ;;  %s2504_s5 = sshll.u32 %s3087_s19, 9 }
  0x64   : > { %513 = vmatprep.mubr.bf16.mxu0 %v3598_v3  ;;  %586 = vmatprep.mubr.bf16.mxu1 %v3598_v3  ;;  %v2607_v4 = vld [vmem:[#allocation8 + $0xe0] ss:$16 sps:$4 sm:$0xff]   ;;  %v2608_v5 = vld [vmem:[#allocation8 + $0xe8] ss:$16 sps:$4 sm:$0xff]   ;;  %v2609_v6 = vld [vmem:[#allocation8 + $0xc4] ss:$16 sps:$4 sm:$0xff]   ;;  %s3543_s24 = scalar_lea.hbm %s3593_s4, %s2504_s5 }
  0x65   : > { %481 = vmatprep.subr.bf16.mxu0 %v2603_v1  ;;  %554 = vmatprep.subr.bf16.mxu1 %v2605_v2  ;;  %v2611_v7 = vld [vmem:[#allocation8 + $0xcc] ss:$16 sps:$4 sm:$0xff]   ;;  %v2613_v8 = vld [vmem:[#allocation8 + $0xc0] ss:$16 sps:$4 sm:$0xff]   ;;  %v2614_v9 = vld [vmem:[#allocation8 + $0xc8] ss:$16 sps:$4 sm:$0xff]  }
  0x66   : > { %482 = vmatpush1.bf16.msra.mxu0 %v2607_v4  ;;  %555 = vmatpush1.bf16.msra.mxu1 %v2608_v5  ;;  %v2615_v10 = vld [vmem:[#allocation8 + $0xa4] ss:$16 sps:$4 sm:$0xff]   ;;  %v2617_v11 = vld [vmem:[#allocation8 + $0xac] ss:$16 sps:$4 sm:$0xff]   ;;  %v2619_v12 = vld [vmem:[#allocation8 + $0xa0] ss:$16 sps:$4 sm:$0xff]  }
  0x67   : > { %483 = vmatprep.subr.bf16.mxu0 %v2609_v6  ;;  %556 = vmatprep.subr.bf16.mxu1 %v2611_v7  ;;  %v2620_v13 = vld [vmem:[#allocation8 + $0xa8] ss:$16 sps:$4 sm:$0xff]   ;;  %v2621_v14 = vld [vmem:[#allocation8 + $0x84] ss:$16 sps:$4 sm:$0xff]   ;;  %v2623_v15 = vld [vmem:[#allocation8 + $0x8c] ss:$16 sps:$4 sm:$0xff]  }
  0x68   : > { %v2625_v16 = vld [vmem:[#allocation8 + $0x80] ss:$16 sps:$4 sm:$0xff]   ;;  %v2626_v17 = vld [vmem:[#allocation8 + $0x88] ss:$16 sps:$4 sm:$0xff]   ;;  %v2627_v18 = vld [vmem:[#allocation8 + $0x64] ss:$16 sps:$4 sm:$0xff]  }
  0x69   : > { %v2629_v19 = vld [vmem:[#allocation8 + $0x6c] ss:$16 sps:$4 sm:$0xff]   ;;  %v2631_v20 = vld [vmem:[#allocation8 + $0x60] ss:$16 sps:$4 sm:$0xff]   ;;  %v2632_v21 = vld [vmem:[#allocation8 + $0x68] ss:$16 sps:$4 sm:$0xff]  }
  0x6a   : > { %484 = vmatpush1.bf16.msra.mxu0 %v2613_v8  ;;  %557 = vmatpush1.bf16.msra.mxu1 %v2614_v9  ;;  %v2633_v22 = vld [vmem:[#allocation8 + $0x44] ss:$16 sps:$4 sm:$0xff]   ;;  %v2635_v23 = vld [vmem:[#allocation8 + $0x4c] ss:$16 sps:$4 sm:$0xff]   ;;  %v2637_v24 = vld [vmem:[#allocation8 + $0x40] ss:$16 sps:$4 sm:$0xff]  }
  0x6b   : > { %485 = vmatprep.subr.bf16.mxu0 %v2615_v10  ;;  %558 = vmatprep.subr.bf16.mxu1 %v2617_v11  ;;  %v2638_v25 = vld [vmem:[#allocation8 + $0x48] ss:$16 sps:$4 sm:$0xff]   ;;  %v2639_v26 = vld [vmem:[#allocation8 + $0x24] ss:$16 sps:$4 sm:$0xff]   ;;  %v2641_v27 = vld [vmem:[#allocation8 + $0x2c] ss:$16 sps:$4 sm:$0xff]   ;;  %v629_v10 = vlaneseq }
  0x6c   : > { %v2643_v28 = vld [vmem:[#allocation8 + $0x20] ss:$16 sps:$4 sm:$0xff]   ;;  %v2644_v29 = vld [vmem:[#allocation8 + $0x28] ss:$16 sps:$4 sm:$0xff]   ;;  %v2645_v30 = vld [vmem:[#allocation8 + $0x4] ss:$16 sps:$4 sm:$0xff]  }
  0x6d   : > { %v2647_v31 = vld [vmem:[#allocation8 + $0xc] ss:$16 sps:$4 sm:$0xff]   ;;  %v2649_v32 = vld [vmem:[#allocation8] ss:$16 sps:$4 sm:$0xff]   ;;  %v2650_v33 = vld [vmem:[#allocation8 + $0x8] ss:$16 sps:$4 sm:$0xff]  }
  0x6e   : > { %486 = vmatpush1.bf16.msra.mxu0 %v2619_v12  ;;  %559 = vmatpush1.bf16.msra.mxu1 %v2620_v13  ;;  %v3214_v34 = vld [vmem:[#allocation10 + $0xe4] ss:$16 sps:$4 sm:$0xff]   ;;  %v3216_v35 = vld [vmem:[#allocation10 + $0xec] ss:$16 sps:$4 sm:$0xff]   ;;  %v3219_v37 = vld [vmem:[#allocation10 + $0xe0] ss:$16 sps:$4 sm:$0xff]  }
  0x6f   : > { %487 = vmatprep.subr.bf16.mxu0 %v2621_v14  ;;  %560 = vmatprep.subr.bf16.mxu1 %v2623_v15  ;;  %v2651_v36 = vld [vmem:[%s3198_s13] sm:$0xff]   ;;  %v3221_v38 = vld [vmem:[#allocation10 + $0xe8] ss:$16 sps:$4 sm:$0xff]   ;;  %v3227_v40 = vld [vmem:[#allocation10 + $0xcc] ss:$16 sps:$4 sm:$0xff]   ;;  %v630_v11 = vshrl.u32 %v629_v10, 7 }
  0x70   : > { %v3225_v39 = vld [vmem:[#allocation10 + $0xc4] ss:$16 sps:$4 sm:$0xff]   ;;  %v3229_v41 = vld [vmem:[#allocation10 + $0xc0] ss:$16 sps:$4 sm:$0xff]   ;;  %v3233_v42 = vld [vmem:[#allocation10 + $0xc8] ss:$16 sps:$4 sm:$0xff]  }
  0x71   : > { %v3237_v43 = vld [vmem:[#allocation10 + $0xa4] ss:$16 sps:$4 sm:$0xff]   ;;  %v3239_v44 = vld [vmem:[#allocation10 + $0xac] ss:$16 sps:$4 sm:$0xff]   ;;  %v3244_v46 = vld [vmem:[#allocation10 + $0xa0] ss:$16 sps:$4 sm:$0xff]  }
  0x72   : > { %488 = vmatpush1.bf16.msra.mxu0 %v2625_v16  ;;  %561 = vmatpush1.bf16.msra.mxu1 %v2626_v17  ;;  %v2664_v45 = vld [vmem:[%s3198_s13 + $0x8] sm:$0xff]   ;;  %v3250_v48 = vld [vmem:[#allocation10 + $0x84] ss:$16 sps:$4 sm:$0xff]   ;;  %v3256_v50 = vld [vmem:[#allocation10 + $0x80] ss:$16 sps:$4 sm:$0xff]   ;;  %v631_v16 = vsub.s32 0, %v630_v11 }
  0x73   : > { %489 = vmatprep.subr.bf16.mxu0 %v2627_v18  ;;  %562 = vmatprep.subr.bf16.mxu1 %v2629_v19  ;;  %v3246_v47 = vld [vmem:[#allocation10 + $0xa8] ss:$16 sps:$4 sm:$0xff]   ;;  %v3254_v49 = vld [vmem:[#allocation10 + $0x8c] ss:$16 sps:$4 sm:$0xff]   ;;  %v3262_v52 = vld [vmem:[#allocation10 + $0x64] ss:$16 sps:$4 sm:$0xff]  }
  0x74   : > { %v3258_v51 = vld [vmem:[#allocation10 + $0x88] ss:$16 sps:$4 sm:$0xff]   ;;  %v3266_v53 = vld [vmem:[#allocation10 + $0x6c] ss:$16 sps:$4 sm:$0xff]   ;;  %v2677_v54 = vld [vmem:[%s3198_s13 + $0x10] sm:$0xff]   ;;  %v639_v17 = vsub.s32 2, %v630_v11 }
  0x75   : > { %v3271_v55 = vld [vmem:[#allocation10 + $0x60] ss:$16 sps:$4 sm:$0xff]   ;;  %v3273_v56 = vld [vmem:[#allocation10 + $0x68] ss:$16 sps:$4 sm:$0xff]   ;;  %v3275_v57 = vld [vmem:[#allocation10 + $0x44] ss:$16 sps:$4 sm:$0xff]  }
  0x76   : > { %490 = vmatpush1.bf16.msra.mxu0 %v2631_v20  ;;  %563 = vmatpush1.bf16.msra.mxu1 %v2632_v21  ;;  %v3277_v58 = vld [vmem:[#allocation10 + $0x4c] ss:$16 sps:$4 sm:$0xff]   ;;  %v3283_v59 = vld [vmem:[#allocation10 + $0x40] ss:$16 sps:$4 sm:$0xff]   ;;  %v3285_v60 = vld [vmem:[#allocation10 + $0x48] ss:$16 sps:$4 sm:$0xff]  }
  0x77   : > { %491 = vmatprep.subr.bf16.mxu0 %v2633_v22  ;;  %564 = vmatprep.subr.bf16.mxu1 %v2635_v23  ;;  %v3287_v61 = vld [vmem:[#allocation10 + $0x24] ss:$16 sps:$4 sm:$0xff]   ;;  %v3289_v62 = vld [vmem:[#allocation10 + $0x2c] ss:$16 sps:$4 sm:$0xff]   ;;  %v3298_v0 = vld [vmem:[#allocation10 + $0x20] ss:$16 sps:$4 sm:$0xff]  }
  0x78   : > { %v2690_v63 = vld [vmem:[%s3198_s13 + $0x18] sm:$0xff]   ;;  %v3302_v2 = vld [vmem:[#allocation10 + $0x4] ss:$16 sps:$4 sm:$0xff]   ;;  %v3310_v5 = vld [vmem:[#allocation10] ss:$16 sps:$4 sm:$0xff]   ;;  %v635_v21 = vsub.s32 1, %v630_v11 }
  0x79   : > { %v3300_v1 = vld [vmem:[#allocation10 + $0x28] ss:$16 sps:$4 sm:$0xff]   ;;  %v3304_v4 = vld [vmem:[#allocation10 + $0xc] ss:$16 sps:$4 sm:$0xff]   ;;  %v721_v7 = vld [vmem:[#allocation3] sm:$0xff]  ;;  %v643_v22 = vsub.s32 3, %v630_v11 }
  0x7a   : > { %492 = vmatpush1.bf16.msra.mxu0 %v2637_v24  ;;  %565 = vmatpush1.bf16.msra.mxu1 %v2638_v25  ;;  %v3314_v6 = vld [vmem:[#allocation10 + $0x8] ss:$16 sps:$4 sm:$0xff]   ;;  %v627_v18 = vld [vmem:[%s3592_s3] sm:$0xf]  ;;  %s2178_s6 = sshll.u32 %s3208_s23, 4  ;;  %s2164_s26 = scalar_lea.sflag [#allocation7], %s3194_s9  ;;  %s3545_s6 = int_to_ptr.vmem [resolvable:$true] %s2178_s6 }
  0x7b   : > { %493 = vmatprep.subr.bf16.mxu0 %v2639_v26  ;;  %566 = vmatprep.subr.bf16.mxu1 %v2641_v27  ;;  %v722_v8 = vld [vmem:[#allocation3 + $0x8] sm:$0xff]  ;;  %v632_v25 = vrot.slane %v627_v18, %v631_v16  ;;  %v3377_v26 = vrot.slane %v627_v18, %v639_v17  ;;  %s2959_s27 = scalar_lea.vmem %s3545_s6, 512  ;;  %p3649_p1 = scmp.ne.s32.totalorder %s3605_s14, 0 }
  0x7c   : > { %v723_v9 = vpack.c.bf16 %v722_v8, %v721_v7  ;;  %p2960_p8 = scmp.ne.s32.totalorder %s3545_s6, %s2959_s27  ;;  %s3038_s19 = smov [#allocation11]  }
  0x7d   : > { %s2963_s28 = sshll.u32 %s3038_s19, 4  ;;  %s2964_s28 = int_to_ptr.vmem [resolvable:$false] %s2963_s28 }
  0x7e   : > { %494 = vmatpush1.bf16.msra.mxu0 %v2643_v28  ;;  %567 = vmatpush1.bf16.msra.mxu1 %v2644_v29  ;;  %v636_v29 = vrot.slane %v627_v18, %v635_v21  ;;  %p2961_p2 = pnand %p2960_p8, %p3649_p1  ;;  %s2965_s30 = scalar_lea.vmem %s2964_s28, 1024 }
  0x7f   : > { %495 = vmatprep.subr.bf16.mxu0 %v2645_v30  ;;  %568 = vmatprep.subr.bf16.mxu1 %v2647_v31  ;;  %v3379_v30 = vrot.slane %v627_v18, %v643_v22  ;;  %p2966_p13 = scmp.lt.s32.totalorder %s3545_s6, %s2964_s28  ;;  %p2967_p7 = scmp.lt.s32.totalorder %s2965_s30, %s2959_s27 }
  0x80   : > { %p2962_p6 = pneg %p2961_p2 }
  0x81   : > { %p2968_p10 = por %p2967_p7, %p2966_p13 }
  0x82   : > { %496 = vmatpush1.bf16.msra.mxu0 %v2649_v32  ;;  %569 = vmatpush1.bf16.msra.mxu1 %v2650_v33 }
  0x83   : > { %916 = vmatprep.subr.bf16.mxu0 %v3214_v34  ;;  %959 = vmatprep.subr.bf16.mxu1 %v3216_v35  ;;  %p2969_p0 = pnand %p2968_p10, %p2962_p6 }
  0x85   : > { %514 = vmatmul.mubr.bf16.vlgmr.msra.gmra.mxu0 %v2651_v36  ;;  %587 = vmatmul.mubr.bf16.vlgmr.msra.gmra.mxu1 %v2651_v36 }
  0x86   : > { %917 = vmatpush1.bf16.msra.mxu0 %v3219_v37  ;;  %960 = vmatpush1.bf16.msra.mxu1 %v3221_v38 }
  0x87   : > { %918 = vmatprep.subr.bf16.mxu0 %v3225_v39  ;;  %961 = vmatprep.subr.bf16.mxu1 %v3227_v40 }
  0x88   : > { %523 = vmatprep.mubr.bf16.mxu0 %v3598_v3  ;;  %596 = vmatprep.mubr.bf16.mxu1 %v3598_v3 }
  0x8a   : > { %919 = vmatpush1.bf16.msra.mxu0 %v3229_v41  ;;  %962 = vmatpush1.bf16.msra.mxu1 %v3233_v42 }
  0x8b   : > { %920 = vmatprep.subr.bf16.mxu0 %v3237_v43  ;;  %963 = vmatprep.subr.bf16.mxu1 %v3239_v44 }
  0x8d   : > { %524 = vmatmul.mubr.bf16.gmra.mxu0 %v2664_v45  ;;  %597 = vmatmul.mubr.bf16.gmra.mxu1 %v2664_v45 }
  0x8e   : > { %921 = vmatpush1.bf16.msra.mxu0 %v3244_v46  ;;  %964 = vmatpush1.bf16.msra.mxu1 %v3246_v47 }
  0x8f   : > { %922 = vmatprep.subr.bf16.mxu0 %v3250_v48  ;;  %965 = vmatprep.subr.bf16.mxu1 %v3254_v49 }
  0x90   : > { %533 = vmatprep.mubr.bf16.mxu0 %v3598_v3  ;;  %606 = vmatprep.mubr.bf16.mxu1 %v3598_v3 }
  0x92   : > { %923 = vmatpush1.bf16.msra.mxu0 %v3256_v50  ;;  %966 = vmatpush1.bf16.msra.mxu1 %v3258_v51 }
  0x93   : > { %924 = vmatprep.subr.bf16.mxu0 %v3262_v52  ;;  %967 = vmatprep.subr.bf16.mxu1 %v3266_v53 }
  0x95   : > { %534 = vmatmul.mubr.bf16.gmra.mxu0 %v2677_v54  ;;  %607 = vmatmul.mubr.bf16.gmra.mxu1 %v2677_v54 }
  0x96   : > { %925 = vmatpush1.bf16.msra.mxu0 %v3271_v55  ;;  %968 = vmatpush1.bf16.msra.mxu1 %v3273_v56 }
  0x97   : > { %926 = vmatprep.subr.bf16.mxu0 %v3275_v57  ;;  %969 = vmatprep.subr.bf16.mxu1 %v3277_v58 }
  0x98   : > { %543 = vmatprep.mubr.bf16.mxu0 %v3598_v3  ;;  %616 = vmatprep.mubr.bf16.mxu1 %v3598_v3 }
  0x9a   : > { %927 = vmatpush1.bf16.msra.mxu0 %v3283_v59  ;;  %970 = vmatpush1.bf16.msra.mxu1 %v3285_v60 }
  0x9b   : > { %928 = vmatprep.subr.bf16.mxu0 %v3287_v61  ;;  %971 = vmatprep.subr.bf16.mxu1 %v3289_v62 }
  0x9d   : > { %544 = vmatmul.mubr.bf16.gmra.mxu0 %v2690_v63  ;;  %617 = vmatmul.mubr.bf16.gmra.mxu1 %v2690_v63 }
  0x9e   : > { %929 = vmatpush1.bf16.msra.mxu0 %v3298_v0  ;;  %972 = vmatpush1.bf16.msra.mxu1 %v3300_v1 }
  0x9f   : > { %930 = vmatprep.subr.bf16.mxu0 %v3302_v2  ;;  %973 = vmatprep.subr.bf16.mxu1 %v3304_v4 }
  0xa0   : > { %948 = vmatprep.mubr.bf16.mxu0 %v3598_v3  ;;  %991 = vmatprep.mubr.bf16.mxu1 %v3598_v3 }
  0xa2   : > { %931 = vmatpush1.bf16.msra.mxu0 %v3310_v5  ;;  %974 = vmatpush1.bf16.msra.mxu1 %v3314_v6 }
  0xa3   : > { %1278 = vmatprep.subr.bf16.mxu0 %v3214_v34  ;;  %1321 = vmatprep.subr.bf16.mxu1 %v3216_v35 }
  0xa5   : > { %949 = vmatmul.mubr.bf16.vlgmr.msra.gmra.mxu0 %v723_v9  ;;  %992 = vmatmul.mubr.bf16.vlgmr.msra.gmra.mxu1 %v723_v9 }
  0xa6   : > { %1279 = vmatpush1.bf16.msra.mxu0 %v3219_v37  ;;  %1322 = vmatpush1.bf16.msra.mxu1 %v3221_v38 }
  0xa7   : > { %1280 = vmatprep.subr.bf16.mxu0 %v3225_v39  ;;  %1323 = vmatprep.subr.bf16.mxu1 %v3227_v40 }
  0xa8   : > { %1310 = vmatprep.mubr.bf16.mxu0 %v3598_v3  ;;  %1353 = vmatprep.mubr.bf16.mxu1 %v3598_v3 }
  0xaa   : > { %1281 = vmatpush1.bf16.msra.mxu0 %v3229_v41  ;;  %1324 = vmatpush1.bf16.msra.mxu1 %v3233_v42 }
  0xab   : > { %1282 = vmatprep.subr.bf16.mxu0 %v3237_v43  ;;  %1325 = vmatprep.subr.bf16.mxu1 %v3239_v44 }
  0xae   : > { %1283 = vmatpush1.bf16.msra.mxu0 %v3244_v46  ;;  %1326 = vmatpush1.bf16.msra.mxu1 %v3246_v47 }
  0xaf   : > { %1284 = vmatprep.subr.bf16.mxu0 %v3250_v48  ;;  %1327 = vmatprep.subr.bf16.mxu1 %v3254_v49 }
  0xb2   : > { %1285 = vmatpush1.bf16.msra.mxu0 %v3256_v50  ;;  %1328 = vmatpush1.bf16.msra.mxu1 %v3258_v51 }
  0xb3   : > { %1286 = vmatprep.subr.bf16.mxu0 %v3262_v52  ;;  %1329 = vmatprep.subr.bf16.mxu1 %v3266_v53 }
  0xb6   : > { %1287 = vmatpush1.bf16.msra.mxu0 %v3271_v55  ;;  %1330 = vmatpush1.bf16.msra.mxu1 %v3273_v56 }
  0xb7   : > { %1288 = vmatprep.subr.bf16.mxu0 %v3275_v57  ;;  %1331 = vmatprep.subr.bf16.mxu1 %v3277_v58 }
  0xba   : > { %1289 = vmatpush1.bf16.msra.mxu0 %v3283_v59  ;;  %1332 = vmatpush1.bf16.msra.mxu1 %v3285_v60 }
  0xbb   : > { %1290 = vmatprep.subr.bf16.mxu0 %v3287_v61  ;;  %1333 = vmatprep.subr.bf16.mxu1 %v3289_v62 }
  0xbe   : > { %1291 = vmatpush1.bf16.msra.mxu0 %v3298_v0  ;;  %1334 = vmatpush1.bf16.msra.mxu1 %v3300_v1 }
  0xbf   : > { %1292 = vmatprep.subr.bf16.mxu0 %v3302_v2  ;;  %1335 = vmatprep.subr.bf16.mxu1 %v3304_v4 }
  0xc2   : > { %1293 = vmatpush1.bf16.msra.mxu0 %v3310_v5  ;;  %1336 = vmatpush1.bf16.msra.mxu1 %v3314_v6 }
  0xc3   : > { %1641 = vmatprep.subr.bf16.mxu0 %v3214_v34  ;;  %1684 = vmatprep.subr.bf16.mxu1 %v3216_v35 }
 0x145   : > { %v3358_v12 = vpop.f32.mrf.mxu0  ;;  %v3360_v13 = vpop.f32.mrf.mxu1 }
 0x147   : > { %v3362_v14 = vpop.f32.mrf.mxu0  ;;  %v3364_v15 = vpop.f32.mrf.mxu1 }
 0x149   : > { %v3369_v19 = vpop.f32.mrf.mxu0  ;;  %v3371_v20 = vpop.f32.mrf.mxu1 }
 0x14b   : > { %v3373_v23 = vpop.f32.mrf.mxu0  ;;  %v3375_v24 = vpop.f32.mrf.mxu1 }
 0x14d   : > { %v525_v27 = vpop.f32.mrf.mxu0  ;;  %v598_v28 = vpop.f32.mrf.mxu1 }
 0x14e   : > { %v3381_v31 = vadd.f32 %v632_v25, %v525_v27  ;;  %v3384_v32 = vadd.f32 %v3377_v26, %v598_v28 }
 0x14f   : > { %v527_v33 = vpop.f32.mrf.mxu0  ;;  %v600_v34 = vpop.f32.mrf.mxu1 }
 0x150   : > { %v3386_v35 = vadd.f32 %v636_v29, %v527_v33  ;;  %v3389_v36 = vadd.f32 %v3379_v30, %v600_v34 }
 0x151   : > { %v529_v45 = vpop.f32.mrf.mxu0  ;;  %v602_v54 = vpop.f32.mrf.mxu1 }
 0x152   : > { %v3391_v63 = vadd.f32 %v632_v25, %v529_v45  ;;  %v3394_v7 = vadd.f32 %v3377_v26, %v602_v54 }
 0x153   : > { %v531_v8 = vpop.f32.mrf.mxu0  ;;  %v604_v9 = vpop.f32.mrf.mxu1 }
 0x154   : > { %3612 = vst [vmem:[#allocation15_spill] sm:$0xff] %v3394_v7  ;;  %v3396_v10 = vadd.f32 %v636_v29, %v531_v8  ;;  %v3399_v11 = vadd.f32 %v3379_v30, %v604_v9  ;;  %v654_v7 = vadd.f32 %v636_v29, %v3373_v23 }
 0x155   : > { %v535_v16 = vpop.f32.mrf.mxu0  ;;  %v608_v17 = vpop.f32.mrf.mxu1 }
 0x156   : > { %3613 = vst [vmem:[#allocation16_spill] sm:$0xff] %v3399_v11  ;;  %v3401_v18 = vadd.f32 %v632_v25, %v535_v16  ;;  %v3404_v21 = vadd.f32 %v3377_v26, %v608_v17 }
 0x157   : > { %v537_v22 = vpop.f32.mrf.mxu0  ;;  %v610_v27 = vpop.f32.mrf.mxu1 }
 0x158   : > { %3614 = vst [vmem:[#allocation17_spill] sm:$0xff] %v3401_v18  ;;  %3615 = vst [vmem:[#allocation18_spill] sm:$0xff] %v3404_v21  ;;  %v3406_v28 = vadd.f32 %v636_v29, %v537_v22  ;;  %v3409_v33 = vadd.f32 %v3379_v30, %v610_v27 }
 0x159   : > { %v539_v34 = vpop.f32.mrf.mxu0  ;;  %v612_v45 = vpop.f32.mrf.mxu1 }
 0x15a   : > { %3616 = vst [vmem:[#allocation19_spill] sm:$0xff] %v3406_v28  ;;  %3617 = vst [vmem:[#allocation20_spill] sm:$0xff] %v3409_v33  ;;  %v3411_v54 = vadd.f32 %v632_v25, %v539_v34  ;;  %v3414_v8 = vadd.f32 %v3377_v26, %v612_v45 }
 0x15b   : > { %v541_v9 = vpop.f32.mrf.mxu0  ;;  %v614_v16 = vpop.f32.mrf.mxu1 }
 0x15c   : > { %3618 = vst [vmem:[#allocation21_spill] sm:$0xff] %v3411_v54  ;;  %3619 = vst [vmem:[#allocation22_spill] sm:$0xff] %v3414_v8  ;;  %v3416_v3 = vadd.f32 %v636_v29, %v541_v9  ;;  %v3419_v17 = vadd.f32 %v3379_v30, %v614_v16 }
 0x15d   : > { %v545_v21 = vpop.f32.mrf.mxu0  ;;  %v618_v22 = vpop.f32.mrf.mxu1 }
 0x15e   : > { %3620 = vst [vmem:[#allocation23_spill] sm:$0xff] %v3416_v3  ;;  %3621 = vst [vmem:[#allocation24_spill] sm:$0xff] %v3419_v17  ;;  %v3421_v28 = vadd.f32 %v632_v25, %v545_v21  ;;  %v3424_v27 = vadd.f32 %v3377_v26, %v618_v22 }
 0x15f   : > { %v547_v33 = vpop.f32.mrf.mxu0  ;;  %v620_v34 = vpop.f32.mrf.mxu1 }
 0x160   : > { %3622 = vst [vmem:[#allocation25_spill] sm:$0xff] %v3421_v28  ;;  %3623 = vst [vmem:[#allocation26_spill] sm:$0xff] %v3424_v27  ;;  %v3426_v54 = vadd.f32 %v636_v29, %v547_v33  ;;  %v3429_v45 = vadd.f32 %v3379_v30, %v620_v34  ;;  %v649_v28 = vadd.f32 %v632_v25, %v3358_v12 }
 0x161   : > { %v549_v8 = vpop.f32.mrf.mxu0  ;;  %v622_v9 = vpop.f32.mrf.mxu1  ;;  %v650_v34 = vadd.f32 %v636_v29, %v3362_v14 }
 0x162   : > { %3624 = vst [vmem:[#allocation27_spill] sm:$0xff] %v3426_v54  ;;  %3625 = vst [vmem:[#allocation28_spill] sm:$0xff] %v3429_v45  ;;  %v3431_v3 = vadd.f32 %v632_v25, %v549_v8  ;;  %v3434_v16 = vadd.f32 %v3377_v26, %v622_v9  ;;  %v653_v8 = vadd.f32 %v632_v25, %v3369_v19 }
 0x163   : > { %v551_v17 = vpop.f32.mrf.mxu0  ;;  %v624_v21 = vpop.f32.mrf.mxu1  ;;  %v652_v19 = vadd.f32 %v3379_v30, %v3364_v15 }
 0x164   : > { %3626 = vst [vmem:[#allocation29_spill] sm:$0xff] %v3431_v3  ;;  %3627 = vst [vmem:[#allocation30_spill] sm:$0xff] %v3434_v16  ;;  %v3437_v22 = vadd.f32 %v636_v29, %v551_v17  ;;  %v3440_v27 = vadd.f32 %v3379_v30, %v624_v21 }
 0x165   : > { %v950_v33 = vpop.f32.mrf.mxu0  ;;  %v993_v54 = vpop.f32.mrf.mxu1 }
 0x166   : > { %3628 = vst [vmem:[#allocation31_spill] sm:$0xff] %v3437_v22  ;;  %3629 = vst [vmem:[#allocation32_spill] sm:$0xff] %v3440_v27  ;;  %v1002_v45 = vadd.f32 %v950_v33, %v649_v28 }
 0x167   : > { %v952_v18 = vpop.f32.mrf.mxu0  ;;  %v995_v17 = vpop.f32.mrf.mxu1 }
 0x168   : > { %v2353_v3 = vmul.f32 -1.442695, %v1002_v45  ;;  %v1003_v9 = vadd.f32 %v952_v18, %v650_v34  ;;  %v651_v18 = vadd.f32 %v3377_v26, %v3360_v13  ;;  %v1005_v23 = vadd.f32 %v995_v17, %v652_v19 }
 0x169   : > { %v954_v16 = vpop.f32.mrf.mxu0  ;;  %v997_v14 = vpop.f32.mrf.mxu1 }
 0x16a   : > { %2751 = vpow2.f32 %v2353_v3  ;;  %v2355_v12 = vmul.f32 -1.442695, %v1003_v9  ;;  %v1006_v22 = vadd.f32 %v954_v16, %v653_v8  ;;  %v656_v3 = vadd.f32 %v3379_v30, %v3375_v24 }
 0x16b   : > { %v956_v11 = vpop.f32.mrf.mxu0  ;;  %v999_v25 = vpop.f32.mrf.mxu1  ;;  %v1004_v29 = vadd.f32 %v993_v54, %v651_v18  ;;  %v1049_v18 = vld [vmem:[#allocation4] sm:$0xff] }
 0x16c   : > { %2753 = vpow2.f32 %v2355_v12  ;;  %v2354_v21 = vmul.f32 -1.442695, %v1006_v22  ;;  %v1007_v27 = vadd.f32 %v956_v11, %v654_v7  ;;  %v1009_v45 = vadd.f32 %v999_v25, %v656_v3  ;;  %v1048_v12 = vld [vmem:[#allocation4 + $0x8] sm:$0xff] }
 0x16d   : > { %v2357_v22 = vmul.f32 -1.442695, %v1005_v23 }
 0x16e   : > { %2755 = vpow2.f32 %v2354_v21  ;;  %v2356_v28 = vmul.f32 -1.442695, %v1007_v27  ;;  %v655_v27 = vadd.f32 %v3377_v26, %v3371_v20  ;;  %v2358_v33 = vmul.f32 -1.442695, %v1009_v45 }
 0x170   : > { %2757 = vpow2.f32 %v2356_v28  ;;  %v1008_v13 = vadd.f32 %v997_v14, %v655_v27 }
 0x171   : > { %2759 = vtanh.f32 %v1004_v29 }
 0x177   : > { %v2752_v16 = vpop.eup %2751 }
 0x178   : > { %v1016_v7 = vadd.f32 1.0, %v2752_v16 }
 0x179   : > { %v2754_v11 = vpop.eup %2753 }
 0x17a   : > { %2761 = vrcp.f32 %v1016_v7  ;;  %v1028_v15 = vadd.f32 1.0, %v2754_v11 }
 0x17b   : > { %v2756_v34 = vpop.eup %2755  ;;  %2763 = vpow2.f32 %v2357_v22 }
 0x17c   : > { %2765 = vrcp.f32 %v1028_v15  ;;  %v1017_v8 = vadd.f32 1.0, %v2756_v34 }
 0x17d   : > { %v2758_v24 = vpop.eup %2757  ;;  %2767 = vpow2.f32 %v2358_v33 }
 0x17e   : > { %2769 = vrcp.f32 %v1017_v8  ;;  %v1029_v30 = vadd.f32 1.0, %v2758_v24  ;;  %v2760_v54 = vpop.eup %2759  ;;  %v3630_v8 = vmov 0  }
 0x17f   : > { %2771 = vtanh.f32 %v1008_v13 }
 0x180   : > { %2773 = vrcp.f32 %v1029_v30 }
 0x187   : > { %v2762_v9 = vpop.eup %2761 }
 0x188   : > { %v2764_v17 = vpop.eup %2763  ;;  %v1052_v21 = vmul.f32 %v2762_v9, %v2760_v54 }
 0x189   : > { %v2766_v20 = vpop.eup %2765  ;;  %v1042_v25 = vadd.f32 1.0, %v2764_v17 }
 0x18a   : > { %v2768_v26 = vpop.eup %2767  ;;  %v1050_v28 = vmul.f32 %v2766_v20, %v1048_v12 }
 0x18b   : > { %v2770_v19 = vpop.eup %2769  ;;  %v1043_v29 = vadd.f32 1.0, %v2768_v26  ;;  %2775 = vrcp.f32 %v1042_v25 }
 0x18c   : > { %v2772_v14 = vpop.eup %2771  ;;  %v3453_v3 = vadd.f32 %v1052_v21, %v1050_v28 }
 0x18d   : > { %v2774_v23 = vpop.eup %2773  ;;  %v1053_v45 = vmul.f32 %v2772_v14, %v2770_v19 }
 0x18e   : > { %v1051_v16 = vmul.f32 %v2774_v23, %v1049_v18  ;;  %2777 = vtanh.f32 %v3453_v3 }
 0x18f   : > { %2779 = vrcp.f32 %v1043_v29 }
 0x190   : > { %v3456_v22 = vadd.f32 %v1053_v45, %v1051_v16 }
 0x192   : > { %2781 = vtanh.f32 %v3456_v22 }
 0x198   : > { %v2776_v7 = vpop.eup %2775 }
 0x19b   : > { %v2778_v11 = vpop.eup %2777 }
 0x19c   : > { %v2780_v27 = vpop.eup %2779  ;;  %v1058_v15 = vmul.f32 %v2778_v11, %v2776_v7  ;;  %v2708_v7 = vld [vmem:[#allocation10 + $0xec] ss:$16 sps:$4 sm:$0xff]   ;;  %v2703_v11 = vld [vmem:[#allocation10 + $0xe0] ss:$16 sps:$4 sm:$0xff]  }
 0x19f   : > { %v2782_v33 = vpop.eup %2781 }
 0x1a0   : > { %v1059_v34 = vmul.f32 %v2782_v33, %v2780_v27  ;;  %v2706_v27 = vld [vmem:[#allocation10 + $0xe8] ss:$16 sps:$4 sm:$0xff]   ;;  %v2711_v33 = vld [vmem:[#allocation10 + $0xc4] ss:$16 sps:$4 sm:$0xff]  }
 0x1a2   : > { %v1085_v13 = vpack.c.bf16 %v1059_v34, %v1058_v15  ;;  %v2714_v15 = vld [vmem:[#allocation10 + $0xcc] ss:$16 sps:$4 sm:$0xff]   ;;  %v2709_v34 = vld [vmem:[#allocation10 + $0xc0] ss:$16 sps:$4 sm:$0xff]  }
 0x1a4   : > { %1311 = vmatmul.mubr.bf16.vlgmr.msra.gmra.mxu0 %v1085_v13  ;;  %1354 = vmatmul.mubr.bf16.vlgmr.msra.gmra.mxu1 %v1085_v13  ;;  %2509 = vst [vmem:[%s3208_s23] sm:$0xff] %v1085_v13   ;;  %v2712_v13 = vld [vmem:[#allocation10 + $0xc8] ss:$16 sps:$4 sm:$0xff]  }
 0x1a5   : > { %1642 = vmatpush1.bf16.msra.mxu0 %v3219_v37  ;;  %1685 = vmatpush1.bf16.msra.mxu1 %v3221_v38 }
 0x1a6   : > { %1643 = vmatprep.subr.bf16.mxu0 %v3225_v39  ;;  %1686 = vmatprep.subr.bf16.mxu1 %v3227_v40 }
 0x1a7   : > { %1673 = vmatprep.mubr.bf16.mxu0 %v3630_v8  ;;  %1716 = vmatprep.mubr.bf16.mxu1 %v3630_v8 }
 0x1a9   : > { %1644 = vmatpush1.bf16.msra.mxu0 %v3229_v41  ;;  %1687 = vmatpush1.bf16.msra.mxu1 %v3233_v42 }
 0x1aa   : > { %1645 = vmatprep.subr.bf16.mxu0 %v3237_v43  ;;  %1688 = vmatprep.subr.bf16.mxu1 %v3239_v44 }
 0x1ad   : > { %1646 = vmatpush1.bf16.msra.mxu0 %v3244_v46  ;;  %1689 = vmatpush1.bf16.msra.mxu1 %v3246_v47 }
 0x1ae   : > { %1647 = vmatprep.subr.bf16.mxu0 %v3250_v48  ;;  %1690 = vmatprep.subr.bf16.mxu1 %v3254_v49 }
 0x1b1   : > { %1648 = vmatpush1.bf16.msra.mxu0 %v3256_v50  ;;  %1691 = vmatpush1.bf16.msra.mxu1 %v3258_v51 }
 0x1b2   : > { %1649 = vmatprep.subr.bf16.mxu0 %v3262_v52  ;;  %1692 = vmatprep.subr.bf16.mxu1 %v3266_v53 }
 0x1b5   : > { %1650 = vmatpush1.bf16.msra.mxu0 %v3271_v55  ;;  %1693 = vmatpush1.bf16.msra.mxu1 %v3273_v56 }
 0x1b6   : > { %1651 = vmatprep.subr.bf16.mxu0 %v3275_v57  ;;  %1694 = vmatprep.subr.bf16.mxu1 %v3277_v58  ;;  %v3631_v58 = vld [vmem:[#allocation16_spill] sm:$0xff] }
 0x1b9   : > { %1652 = vmatpush1.bf16.msra.mxu0 %v3283_v59  ;;  %1695 = vmatpush1.bf16.msra.mxu1 %v3285_v60 }
 0x1ba   : > { %1653 = vmatprep.subr.bf16.mxu0 %v3287_v61  ;;  %1696 = vmatprep.subr.bf16.mxu1 %v3289_v62  ;;  %v3632_v61 = vld [vmem:[#allocation15_spill] sm:$0xff] }
 0x1bd   : > { %1654 = vmatpush1.bf16.msra.mxu0 %v3298_v0  ;;  %1697 = vmatpush1.bf16.msra.mxu1 %v3300_v1 }
 0x1be   : > { %1655 = vmatprep.subr.bf16.mxu0 %v3302_v2  ;;  %1698 = vmatprep.subr.bf16.mxu1 %v3304_v4 }
 0x1c1   : > { %1656 = vmatpush1.bf16.msra.mxu0 %v3310_v5  ;;  %1699 = vmatpush1.bf16.msra.mxu1 %v3314_v6 }
 0x1c2   : > { %2047 = vmatprep.subr.bf16.mxu1 %v2708_v7 }
 0x264   : > { %v1312_v37 = vpop.f32.mrf.mxu0  ;;  %v1355_v39 = vpop.f32.mrf.mxu1 }
 0x265   : > { %v1364_v38 = vadd.f32 %v1312_v37, %v3381_v31  ;;  %v1366_v56 = vadd.f32 %v1355_v39, %v3384_v32  ;;  %v2717_v37 = vld [vmem:[#allocation10 + $0xa4] ss:$16 sps:$4 sm:$0xff]   ;;  %v2715_v39 = vld [vmem:[#allocation10 + $0xa0] ss:$16 sps:$4 sm:$0xff]  }
 0x266   : > { %v1314_v40 = vpop.f32.mrf.mxu0  ;;  %v1357_v46 = vpop.f32.mrf.mxu1 }
 0x267   : > { %v2393_v41 = vmul.f32 -1.442695, %v1364_v38  ;;  %v1365_v42 = vadd.f32 %v1314_v40, %v3386_v35  ;;  %v1367_v53 = vadd.f32 %v1357_v46, %v3389_v36  ;;  %v2720_v38 = vld [vmem:[#allocation10 + $0xac] ss:$16 sps:$4 sm:$0xff]   ;;  %v2723_v40 = vld [vmem:[#allocation10 + $0x84] ss:$16 sps:$4 sm:$0xff]  }
 0x268   : > { %v1316_v43 = vpop.f32.mrf.mxu0  ;;  %v1359_v51 = vpop.f32.mrf.mxu1  ;;  %v2732_v46 = vld [vmem:[#allocation10 + $0x6c] ss:$16 sps:$4 sm:$0xff]  }
 0x269   : > { %2783 = vpow2.f32 %v2393_v41  ;;  %v2395_v44 = vmul.f32 -1.442695, %v1365_v42  ;;  %v1368_v47 = vadd.f32 %v1316_v43, %v3391_v63  ;;  %v2397_v57 = vmul.f32 -1.442695, %v1367_v53  ;;  %v2726_v41 = vld [vmem:[#allocation10 + $0x8c] ss:$16 sps:$4 sm:$0xff]  }
 0x26a   : > { %v1318_v48 = vpop.f32.mrf.mxu0  ;;  %v1361_v55 = vpop.f32.mrf.mxu1  ;;  %v1370_v62 = vadd.f32 %v1359_v51, %v3632_v61  ;;  %v2721_v42 = vld [vmem:[#allocation10 + $0x80] ss:$16 sps:$4 sm:$0xff]   ;;  %v2724_v43 = vld [vmem:[#allocation10 + $0x88] ss:$16 sps:$4 sm:$0xff]   ;;  %v2741_v53 = vld [vmem:[#allocation10 + $0x24] ss:$16 sps:$4 sm:$0xff]  }
 0x26b   : > { %2785 = vpow2.f32 %v2395_v44  ;;  %v2394_v49 = vmul.f32 -1.442695, %v1368_v47  ;;  %v1369_v50 = vadd.f32 %v1318_v48, %v3396_v10  ;;  %v1371_v59 = vadd.f32 %v1361_v55, %v3631_v58  ;;  %v2729_v44 = vld [vmem:[#allocation10 + $0x64] ss:$16 sps:$4 sm:$0xff]   ;;  %v2727_v47 = vld [vmem:[#allocation10 + $0x60] ss:$16 sps:$4 sm:$0xff]  }
 0x26c   : > { %v2730_v48 = vld [vmem:[#allocation10 + $0x68] ss:$16 sps:$4 sm:$0xff]   ;;  %v2733_v51 = vld [vmem:[#allocation10 + $0x40] ss:$16 sps:$4 sm:$0xff]   ;;  %v2744_v55 = vld [vmem:[#allocation10 + $0x2c] ss:$16 sps:$4 sm:$0xff]  }
 0x26d   : > { %2787 = vpow2.f32 %v2394_v49  ;;  %v2396_v52 = vmul.f32 -1.442695, %v1369_v50  ;;  %v2398_v2 = vmul.f32 -1.442695, %v1371_v59  ;;  %v2735_v49 = vld [vmem:[#allocation10 + $0x44] ss:$16 sps:$4 sm:$0xff]  }
 0x26e   : > { %v2738_v50 = vld [vmem:[#allocation10 + $0x4c] ss:$16 sps:$4 sm:$0xff]   ;;  %v2745_v58 = vld [vmem:[#allocation10] ss:$16 sps:$4 sm:$0xff]   ;;  %v2747_v59 = vld [vmem:[#allocation10 + $0x4] ss:$16 sps:$4 sm:$0xff]  }
 0x26f   : > { %2789 = vpow2.f32 %v2396_v52  ;;  %v2736_v52 = vld [vmem:[#allocation10 + $0x48] ss:$16 sps:$4 sm:$0xff]   ;;  %v2750_v61 = vld [vmem:[#allocation10 + $0xc] ss:$16 sps:$4 sm:$0xff]  }
 0x270   : > { %2791 = vtanh.f32 %v1366_v56  ;;  %v2739_v56 = vld [vmem:[#allocation10 + $0x20] ss:$16 sps:$4 sm:$0xff]  }
 0x271   : > { %2793 = vpow2.f32 %v2397_v57  ;;  %v2742_v57 = vld [vmem:[#allocation10 + $0x28] ss:$16 sps:$4 sm:$0xff]  }
 0x276   : > { %v2784_v60 = vpop.eup %2783 }
 0x277   : > { %v1378_v0 = vadd.f32 1.0, %v2784_v60  ;;  %v2748_v60 = vld [vmem:[#allocation10 + $0x8] ss:$16 sps:$4 sm:$0xff]  }
 0x278   : > { %v2786_v1 = vpop.eup %2785 }
 0x279   : > { %2795 = vrcp.f32 %v1378_v0  ;;  %v1390_v4 = vadd.f32 1.0, %v2786_v1  ;;  %v3633_v0 = vld [vmem:[#allocation17_spill] sm:$0xff] }
 0x27a   : > { %v2788_v5 = vpop.eup %2787  ;;  %2797 = vtanh.f32 %v1370_v62 }
 0x27b   : > { %2799 = vrcp.f32 %v1390_v4  ;;  %v1379_v6 = vadd.f32 1.0, %v2788_v5 }
 0x27c   : > { %v2790_v31 = vpop.eup %2789  ;;  %2801 = vpow2.f32 %v2398_v2 }
 0x27d   : > { %2803 = vrcp.f32 %v1379_v6  ;;  %v1391_v32 = vadd.f32 1.0, %v2790_v31  ;;  %v2792_v35 = vpop.eup %2791  ;;  %v3634_v6 = vld [vmem:[#allocation19_spill] sm:$0xff] }
 0x27e   : > { %v2794_v36 = vpop.eup %2793 }
 0x27f   : > { %2805 = vrcp.f32 %v1391_v32  ;;  %v1404_v17 = vadd.f32 1.0, %v2794_v36 }
 0x281   : > { %2807 = vrcp.f32 %v1404_v17 }
 0x286   : > { %v2796_v63 = vpop.eup %2795 }
 0x287   : > { %v2798_v10 = vpop.eup %2797  ;;  %v1414_v24 = vmul.f32 %v2796_v63, %v2792_v35  ;;  %v3635_v63 = vld [vmem:[#allocation21_spill] sm:$0xff] }
 0x288   : > { %v2800_v30 = vpop.eup %2799 }
 0x289   : > { %v2802_v54 = vpop.eup %2801  ;;  %v1412_v9 = vmul.f32 %v2800_v30, %v3453_v3 }
 0x28a   : > { %v2804_v12 = vpop.eup %2803  ;;  %v1405_v28 = vadd.f32 1.0, %v2802_v54  ;;  %v3636_v54 = vld [vmem:[#allocation23_spill] sm:$0xff] }
 0x28b   : > { %v3501_v20 = vadd.f32 %v1414_v24, %v1412_v9  ;;  %v1415_v26 = vmul.f32 %v2804_v12, %v2798_v10 }
 0x28c   : > { %v2806_v21 = vpop.eup %2805 }
 0x28d   : > { %v1413_v19 = vmul.f32 %v2806_v21, %v3456_v22  ;;  %2809 = vtanh.f32 %v3501_v20  ;;  %v2705_v22 = vld [vmem:[#allocation10 + $0xe4] ss:$16 sps:$4 sm:$0xff]  }
 0x28e   : > { %2811 = vrcp.f32 %v1405_v28  ;;  %v2808_v18 = vpop.eup %2807  ;;  %2004 = vmatprep.subr.bf16.mxu0 %v2705_v22 }
 0x28f   : > { %v3505_v25 = vadd.f32 %v1415_v26, %v1413_v19  ;;  %v3637_v26 = vld [vmem:[#allocation20_spill] sm:$0xff]  ;;  %v3638_v19 = vld [vmem:[#allocation18_spill] sm:$0xff] }
 0x291   : > { %2813 = vtanh.f32 %v3505_v25 }
 0x29a   : > { %v2810_v14 = vpop.eup %2809 }
 0x29b   : > { %v2812_v3 = vpop.eup %2811  ;;  %v1420_v29 = vmul.f32 %v2810_v14, %v2808_v18 }
 0x29e   : > { %v2814_v23 = vpop.eup %2813 }
 0x29f   : > { %v1421_v45 = vmul.f32 %v2814_v23, %v2812_v3  ;;  %v3639_v3 = vld [vmem:[#allocation24_spill] sm:$0xff] }
 0x2a1   : > { %v1448_v16 = vpack.c.bf16 %v1421_v45, %v1420_v29  ;;  %v3640_v45 = vld [vmem:[#allocation22_spill] sm:$0xff] }
 0x2a3   : > { %1674 = vmatmul.mubr.bf16.vlgmr.msra.gmra.mxu0 %v1448_v16  ;;  %1717 = vmatmul.mubr.bf16.vlgmr.msra.gmra.mxu1 %v1448_v16  ;;  %2525 = vst [vmem:[%s3208_s23 + $0x8] sm:$0xff] %v1448_v16  }
 0x2a4   : > { %2036 = vmatprep.mubr.bf16.mxu0 %v3630_v8  ;;  %2079 = vmatprep.mubr.bf16.mxu1 %v3630_v8  ;;  %v2718_v8 = vld [vmem:[#allocation10 + $0xa8] ss:$16 sps:$4 sm:$0xff]  }
 0x2a5   : > { %2005 = vmatpush1.bf16.msra.mxu0 %v2703_v11  ;;  %2048 = vmatpush1.bf16.msra.mxu1 %v2706_v27 }
 0x2a6   : > { %2006 = vmatprep.subr.bf16.mxu0 %v2711_v33  ;;  %2049 = vmatprep.subr.bf16.mxu1 %v2714_v15 }
 0x2a9   : > { %2007 = vmatpush1.bf16.msra.mxu0 %v2709_v34  ;;  %2050 = vmatpush1.bf16.msra.mxu1 %v2712_v13 }
 0x2aa   : > { %2008 = vmatprep.subr.bf16.mxu0 %v2717_v37  ;;  %2051 = vmatprep.subr.bf16.mxu1 %v2720_v38 }
 0x2ad   : > { %2009 = vmatpush1.bf16.msra.mxu0 %v2715_v39  ;;  %2052 = vmatpush1.bf16.msra.mxu1 %v2718_v8 }
 0x2ae   : > { %2010 = vmatprep.subr.bf16.mxu0 %v2723_v40  ;;  %2053 = vmatprep.subr.bf16.mxu1 %v2726_v41 }
 0x2b1   : > { %2011 = vmatpush1.bf16.msra.mxu0 %v2721_v42  ;;  %2054 = vmatpush1.bf16.msra.mxu1 %v2724_v43 }
 0x2b2   : > { %2012 = vmatprep.subr.bf16.mxu0 %v2729_v44  ;;  %2055 = vmatprep.subr.bf16.mxu1 %v2732_v46 }
 0x2b5   : > { %2013 = vmatpush1.bf16.msra.mxu0 %v2727_v47  ;;  %2056 = vmatpush1.bf16.msra.mxu1 %v2730_v48 }
 0x2b6   : > { %2014 = vmatprep.subr.bf16.mxu0 %v2735_v49  ;;  %2057 = vmatprep.subr.bf16.mxu1 %v2738_v50 }
 0x2b9   : > { %2015 = vmatpush1.bf16.msra.mxu0 %v2733_v51  ;;  %2058 = vmatpush1.bf16.msra.mxu1 %v2736_v52 }
 0x2ba   : > { %2016 = vmatprep.subr.bf16.mxu0 %v2741_v53  ;;  %2059 = vmatprep.subr.bf16.mxu1 %v2744_v55 }
 0x2bd   : > { %2017 = vmatpush1.bf16.msra.mxu0 %v2739_v56  ;;  %2060 = vmatpush1.bf16.msra.mxu1 %v2742_v57 }
 0x2be   : > { %2018 = vmatprep.subr.bf16.mxu0 %v2747_v59  ;;  %2061 = vmatprep.subr.bf16.mxu1 %v2750_v61 }
 0x2c1   : > { %2019 = vmatpush1.bf16.msra.mxu0 %v2745_v58  ;;  %2062 = vmatpush1.bf16.msra.mxu1 %v2748_v60 }
 0x363   : > { %v1675_v62 = vpop.f32.mrf.mxu0  ;;  %v1718_v2 = vpop.f32.mrf.mxu1 }
 0x364   : > { %v1727_v1 = vadd.f32 %v1675_v62, %v3633_v0  ;;  %v1729_v18 = vadd.f32 %v1718_v2, %v3638_v19  ;;  %v3642_v2 = vld [vmem:[#allocation27_spill] sm:$0xff]  ;;  %v3647_v19 = vld [vmem:[#allocation32_spill] sm:$0xff] }
 0x365   : > { %v1677_v4 = vpop.f32.mrf.mxu0  ;;  %v1720_v36 = vpop.f32.mrf.mxu1 }
 0x366   : > { %v2435_v5 = vmul.f32 -1.442695, %v1727_v1  ;;  %v1728_v31 = vadd.f32 %v1677_v4, %v3634_v6  ;;  %v1730_v21 = vadd.f32 %v1720_v36, %v3637_v26  ;;  %v3646_v26 = vld [vmem:[#allocation26_spill] sm:$0xff] }
 0x367   : > { %v1679_v32 = vpop.f32.mrf.mxu0  ;;  %v1722_v12 = vpop.f32.mrf.mxu1 }
 0x368   : > { %2815 = vpow2.f32 %v2435_v5  ;;  %v2437_v35 = vmul.f32 -1.442695, %v1728_v31  ;;  %v1731_v10 = vadd.f32 %v1679_v32, %v3635_v63  ;;  %v2439_v14 = vmul.f32 -1.442695, %v1730_v21  ;;  %v3643_v32 = vld [vmem:[#allocation29_spill] sm:$0xff] }
 0x369   : > { %v1681_v24 = vpop.f32.mrf.mxu0  ;;  %v1724_v28 = vpop.f32.mrf.mxu1  ;;  %v1733_v16 = vadd.f32 %v1722_v12, %v3640_v45 }
 0x36a   : > { %2817 = vpow2.f32 %v2437_v35  ;;  %v2436_v30 = vmul.f32 -1.442695, %v1731_v10  ;;  %v1732_v9 = vadd.f32 %v1681_v24, %v3636_v54  ;;  %v1734_v23 = vadd.f32 %v1724_v28, %v3639_v3  ;;  %v3644_v10 = vld [vmem:[#allocation31_spill] sm:$0xff]  ;;  %v3648_v3 = vld [vmem:[#allocation30_spill] sm:$0xff] }
 0x36c   : > { %2819 = vpow2.f32 %v2436_v30  ;;  %v2438_v17 = vmul.f32 -1.442695, %v1732_v9  ;;  %v2440_v11 = vmul.f32 -1.442695, %v1734_v23  ;;  %v3645_v9 = vld [vmem:[#allocation28_spill] sm:$0xff] }
 0x36e   : > { %2821 = vpow2.f32 %v2438_v17 }
 0x36f   : > { %2823 = vtanh.f32 %v1729_v18 }
 0x370   : > { %2825 = vpow2.f32 %v2439_v14 }
 0x375   : > { %v2816_v29 = vpop.eup %2815 }
 0x376   : > { %v1741_v22 = vadd.f32 1.0, %v2816_v29 }
 0x377   : > { %v2818_v7 = vpop.eup %2817 }
 0x378   : > { %2827 = vrcp.f32 %v1741_v22  ;;  %v1753_v27 = vadd.f32 1.0, %v2818_v7 }
 0x379   : > { %v2820_v33 = vpop.eup %2819  ;;  %2829 = vtanh.f32 %v1733_v16 }
 0x37a   : > { %2831 = vrcp.f32 %v1753_v27  ;;  %v1742_v15 = vadd.f32 1.0, %v2820_v33 }
 0x37b   : > { %v2822_v34 = vpop.eup %2821  ;;  %2833 = vpow2.f32 %v2440_v11 }
 0x37c   : > { %2835 = vrcp.f32 %v1742_v15  ;;  %v1754_v13 = vadd.f32 1.0, %v2822_v34  ;;  %v2824_v37 = vpop.eup %2823 }
 0x37d   : > { %v2826_v38 = vpop.eup %2825 }
 0x37e   : > { %2837 = vrcp.f32 %v1754_v13  ;;  %v1767_v46 = vadd.f32 1.0, %v2826_v38 }
 0x380   : > { %2839 = vrcp.f32 %v1767_v46 }
 0x385   : > { %v2828_v39 = vpop.eup %2827 }
 0x386   : > { %v2830_v8 = vpop.eup %2829  ;;  %v1777_v40 = vmul.f32 %v2828_v39, %v2824_v37 }
 0x387   : > { %v2832_v41 = vpop.eup %2831 }
 0x388   : > { %v2834_v42 = vpop.eup %2833  ;;  %v1775_v43 = vmul.f32 %v2832_v41, %v3501_v20 }
 0x389   : > { %v2836_v44 = vpop.eup %2835  ;;  %v1768_v50 = vadd.f32 1.0, %v2834_v42 }
 0x38a   : > { %v3520_v47 = vadd.f32 %v1777_v40, %v1775_v43  ;;  %v1778_v48 = vmul.f32 %v2836_v44, %v2830_v8 }
 0x38b   : > { %v2838_v49 = vpop.eup %2837 }
 0x38c   : > { %v1776_v51 = vmul.f32 %v2838_v49, %v3505_v25  ;;  %2841 = vtanh.f32 %v3520_v47  ;;  %v3641_v25 = vld [vmem:[#allocation25_spill] sm:$0xff] }
 0x38d   : > { %2843 = vrcp.f32 %v1768_v50  ;;  %v2840_v53 = vpop.eup %2839 }
 0x38e   : > { %v3524_v52 = vadd.f32 %v1778_v48, %v1776_v51 }
 0x390   : > { %2845 = vtanh.f32 %v3524_v52 }
 0x399   : > { %v2842_v20 = vpop.eup %2841 }
 0x39a   : > { %v2844_v55 = vpop.eup %2843  ;;  %v1783_v57 = vmul.f32 %v2842_v20, %v2840_v53 }
 0x39d   : > { %v2846_v56 = vpop.eup %2845 }
 0x39e   : > { %v1784_v58 = vmul.f32 %v2846_v56, %v2844_v55 }
 0x3a0   : > { %v1811_v59 = vpack.c.bf16 %v1784_v58, %v1783_v57 }
 0x3a2   : > { %2037 = vmatmul.mubr.bf16.vlgmr.msra.gmra.mxu0 %v1811_v59  ;;  %2080 = vmatmul.mubr.bf16.vlgmr.msra.gmra.mxu1 %v1811_v59  ;;  %2526 = vst [vmem:[%s3208_s23 + $0x10] sm:$0xff] %v1811_v59  }
 0x462   : > { %v2038_v60 = vpop.f32.mrf.mxu0  ;;  %v2081_v62 = vpop.f32.mrf.mxu1 }
 0x463   : > { %v2090_v61 = vadd.f32 %v2038_v60, %v3641_v25  ;;  %v2092_v21 = vadd.f32 %v2081_v62, %v3646_v26 }
 0x464   : > { %v2040_v0 = vpop.f32.mrf.mxu0  ;;  %v2083_v31 = vpop.f32.mrf.mxu1 }
 0x465   : > { %v2477_v1 = vmul.f32 -1.442695, %v2090_v61  ;;  %v2091_v4 = vadd.f32 %v2040_v0, %v3642_v2  ;;  %v2093_v12 = vadd.f32 %v2083_v31, %v3645_v9 }
 0x466   : > { %v2042_v5 = vpop.f32.mrf.mxu0  ;;  %v2085_v30 = vpop.f32.mrf.mxu1 }
 0x467   : > { %2847 = vpow2.f32 %v2477_v1  ;;  %v2479_v6 = vmul.f32 -1.442695, %v2091_v4  ;;  %v2094_v35 = vadd.f32 %v2042_v5, %v3643_v32  ;;  %v2481_v28 = vmul.f32 -1.442695, %v2093_v12 }
 0x468   : > { %v2044_v36 = vpop.f32.mrf.mxu0  ;;  %v2087_v17 = vpop.f32.mrf.mxu1  ;;  %v2096_v23 = vadd.f32 %v2085_v30, %v3648_v3 }
 0x469   : > { %2849 = vpow2.f32 %v2479_v6  ;;  %v2478_v63 = vmul.f32 -1.442695, %v2094_v35  ;;  %v2095_v24 = vadd.f32 %v2044_v36, %v3644_v10  ;;  %v2097_v18 = vadd.f32 %v2087_v17, %v3647_v19 }
 0x46b   : > { %2851 = vpow2.f32 %v2478_v63  ;;  %v2480_v54 = vmul.f32 -1.442695, %v2095_v24  ;;  %v2482_v16 = vmul.f32 -1.442695, %v2097_v18 }
 0x46d   : > { %2853 = vpow2.f32 %v2480_v54 }
 0x46e   : > { %2855 = vtanh.f32 %v2092_v21 }
 0x46f   : > { %2857 = vpow2.f32 %v2481_v28 }
 0x474   : > { %v2848_v14 = vpop.eup %2847 }
 0x475   : > { %v2104_v29 = vadd.f32 1.0, %v2848_v14 }
 0x476   : > { %v2850_v45 = vpop.eup %2849 }
 0x477   : > { %2859 = vrcp.f32 %v2104_v29  ;;  %v2116_v22 = vadd.f32 1.0, %v2850_v45 }
 0x478   : > { %v2852_v7 = vpop.eup %2851  ;;  %2861 = vtanh.f32 %v2096_v23 }
 0x479   : > { %2863 = vrcp.f32 %v2116_v22  ;;  %v2105_v11 = vadd.f32 1.0, %v2852_v7 }
 0x47a   : > { %v2854_v27 = vpop.eup %2853  ;;  %2865 = vpow2.f32 %v2482_v16 }
 0x47b   : > { %2867 = vrcp.f32 %v2105_v11  ;;  %v2117_v33 = vadd.f32 1.0, %v2854_v27  ;;  %v2856_v15 = vpop.eup %2855 }
 0x47c   : > { %v2858_v34 = vpop.eup %2857 }
 0x47d   : > { %2869 = vrcp.f32 %v2117_v33  ;;  %v2130_v8 = vadd.f32 1.0, %v2858_v34 }
 0x47f   : > { %2871 = vrcp.f32 %v2130_v8 }
 0x484   : > { %v2860_v13 = vpop.eup %2859 }
 0x485   : > { %v2862_v37 = vpop.eup %2861  ;;  %v2140_v38 = vmul.f32 %v2860_v13, %v2856_v15 }
 0x486   : > { %v2864_v39 = vpop.eup %2863 }
 0x487   : > { %v2866_v40 = vpop.eup %2865  ;;  %v2138_v41 = vmul.f32 %v2864_v39, %v3520_v47 }
 0x488   : > { %v2868_v42 = vpop.eup %2867  ;;  %v2131_v48 = vadd.f32 1.0, %v2866_v40 }
 0x489   : > { %v2142_v43 = vadd.f32 %v2140_v38, %v2138_v41  ;;  %v2141_v44 = vmul.f32 %v2868_v42, %v2862_v37 }
 0x48a   : > { %v2870_v46 = vpop.eup %2869 }
 0x48b   : > { %2873 = vtanh.f32 %v2142_v43  ;;  %2148 = vst [vmem:[#allocation4 + $0x8] sm:$0xff] %v2142_v43  ;;  %v2139_v49 = vmul.f32 %v2870_v46, %v3524_v52 }
 0x48c   : > { %2875 = vrcp.f32 %v2131_v48  ;;  %v2872_v51 = vpop.eup %2871 }
 0x48d   : > { %v2143_v50 = vadd.f32 %v2141_v44, %v2139_v49 }
 0x48f   : > { %2877 = vtanh.f32 %v2143_v50  ;;  %2149 = vst [vmem:[#allocation4] sm:$0xff] %v2143_v50 }
 0x498   : > { %v2874_v47 = vpop.eup %2873 }
 0x499   : > { %v2146_v53 = vmul.f32 %v2874_v47, %v2872_v51  ;;  %v2876_v20 = vpop.eup %2875 }
 0x49b   : > { %2150 = vst [vmem:[#allocation3] sm:$0xff] %v2146_v53 }
 0x49c   : > { %v2878_v55 = vpop.eup %2877 }
 0x49d   : > { %v2147_v56 = vmul.f32 %v2878_v55, %v2876_v20 }
 0x49f   : > { %2151 = vst [vmem:[#allocation3 + $0x8] sm:$0xff] %v2147_v56  ;;  %v2523_v52 = vpack.c.bf16 %v2147_v56, %v2146_v53 }
 0x4a1   : > { %2527 = vst [vmem:[%s3208_s23 + $0x18] sm:$0xff] %v2523_v52  }
 0x4a2   : > { %2972 = shalt.err (!%p2969_p0)
}
 0x4a3   : > { %s2973_s8 = scalar_lea.hbm %s3543_s24, 512  ;;  %s2977_s13 = scalar_lea.hbm %s3593_s4, 1024 }
 0x4a4   : > { %p2974_p11 = scmp.ne.s32.totalorder %s3543_s24, %s2973_s8  ;;  %p2978_p9 = scmp.lt.s32.totalorder %s3543_s24, %s3593_s4 }
 0x4a5   : > { %p2979_p5 = scmp.lt.s32.totalorder %s2977_s13, %s2973_s8 }
 0x4a6   : > { %p2975_p3 = pnand %p2974_p11, %p3649_p1 }
 0x4a7   : > { %p2980_p12 = por %p2979_p5, %p2978_p9 }
 0x4a8   : > { %p2976_p4 = pneg %p2975_p3 }
 0x4aa   : > { %p2981_p8 = pnand %p2980_p12, %p2976_p4 }
 0x4ac   : > { %2984 = shalt.err (!%p2981_p8)
}
 0x4ad   : > { %s3039_s29 = smov 64   ;;  %s3040_s5 = smov 4  }
 0x4ae   : > { %2538 = dma.vmem_to_hbm [thread:$0]  (%p3649_p1), %s3545_s6, 512, %s3543_s24, %s2164_s26, %s3039_s29, %s3039_s29, %s3040_s5  }
 0x4af PF: > { %s2193_s7 = sand.u32 1, %s3015_s15   ;;  %p3650_p2 = scmp.ne.s32.totalorder %s3601_s22, 0 }
 0x4b0   : > { %p3651_p6 = scmp.ge.s32.totalorder %s3027_s18, 2  ;;  %s2194_s25 = scalar_lea.sflag [#allocation7], %s2193_s7 }
 0x4b2   : > { %p2552_p13 = pnand %p3651_p6, %p3650_p2 }
 0x4b4   : > { %p2553_p7 = pneg %p2552_p13 }
 0x4b6   : > { %3010 = dma.done.wait (%p2553_p7), %s2194_s25, 512  }
 0x4b7   : > { %3012 = vsyncadd (%p2553_p7), %s2194_s25, 4294966784  ;;  %p18_p10 = scmp.ge.s32.totalorder %s3139_s11, 4   ;;  %s3652_s15 = smov %s3019_s16 }
 0x4b8   : > { %s3653_s16 = smov %s3023_s17  ;;  %s3654_s17 = smov %s3155_s20 }
 0x4b9   : > { %s3655_s18 = smov %s3139_s11  ;;  %20 = sbr.rel (!%p18_p10) target bundleno = 6 (0x6), region = 99 }
 0x4be   :  { %2199 = vsyncpa [#allocation6], 1 }
 0x4bf   :  { %2201 = vsyncpa [#allocation6 + $0x1], 1 }
 0x4c0   :  { %2202 = vsyncpa [#allocation9], 1 }
 0x4c1   :  { %2203 = vsyncpa [#allocation7], 1 }
 0x4c2   :  { %2205 = vsyncpa [#allocation7 + $0x1], 1 }

</bundles_post_ra>
